<compile_context>
chip_gen: v7x
topology: tpu7x:2x2x1
jax: 0.10.0
libtpu: 0.0.40
codegen_flags: <defaults>
</compile_context>

<pallas_src>
import functools

import jax
import jax.numpy as jnp
from jax.experimental import pallas as pl
from jax.experimental.pallas import tpu as pltpu


def _ru128(v):
    return ((v + 127) // 128) * 128


# ------------------------------ kernel --------------------------------------

def _lksnet_kernel(*refs, kernel_sizes):
    """Fused LKSNet forward for one batch tile of Bt images.

    refs = (x, w1, b1, ..., wL, bL, pool, fc_w, fc_b, out) with
      x     : (Bt*H, L0)          f32   row-stacked images, lanes padded to 128
      w_i   : (K_i*Lin_i, Lout_i) bf16  fused banded conv weight (BN folded)
      b_i   : (1, Lout_i)         f32   conv bias + BN shift, tiled over Wo
      pool  : (Bt, Bt*H)          f32   0/1 row-pool matrix (valid rows only)
      fc_w  : (Llast, ncls_pad)   bf16  avg-pool scale folded in, class-padded
      fc_b  : (1, ncls_pad)       f32
      out   : (1, Bt, ncls_pad)   f32
    """
    x_ref, o_ref = refs[0], refs[-1]
    pool_ref, fcw_ref, fcb_ref = refs[-4], refs[-3], refs[-2]
    conv_refs = refs[1:-4]

    xf = x_ref[...]                                    # (R, L0) f32, R = Bt*H

    for layer, k in enumerate(kernel_sizes):
        w_ref = conv_refs[2 * layer]
        b_ref = conv_refs[2 * layer + 1]
        xb = xf.astype(jnp.bfloat16)                   # ONE cast per layer
        # Fused-K LHS: stack the K row-shifted slabs along the 128-aligned
        # lane axis.  Row shifts that run past an image's valid height only
        # feed output rows that are themselves invalid (masked out by the
        # pooling matrix), so the wraparound rows are harmless.
        slabs = [xb]
        for kh in range(1, k):
            slabs.append(jnp.concatenate([xb[kh:, :], xb[:kh, :]], axis=0))
        lhs = slabs[0] if k == 1 else jnp.concatenate(slabs, axis=1)  # (R, K*Lin)
        # One MXU matmul per layer (contraction = K*Lin), f32 accumulation.
        acc = jnp.dot(lhs, w_ref[...], preferred_element_type=jnp.float32)
        # Conv bias + folded BatchNorm shift, then ReLU (f32 on the VPU).
        xf = jnp.maximum(acc + b_ref[...], 0.0)        # (R, Lout) f32

    # Global average pool (1/(Ho*Wo) folded into fc_w): a tiny f32 matmul with
    # a 0/1 pooling matrix that selects each image's valid rows, then the FC.
    pooled = jnp.dot(pool_ref[...], xf,
                     preferred_element_type=jnp.float32)          # (Bt, Llast)
    logits = jnp.dot(pooled.astype(jnp.bfloat16), fcw_ref[...],
                     preferred_element_type=jnp.float32) + fcb_ref[...]
    o_ref[...] = logits.reshape(o_ref.shape).astype(o_ref.dtype)


# ------------------------- host-side weight packing --------------------------

def _band_conv_weight(w_hwio, w_in):
    """Pack an HWIO conv weight into KH banded matrices so that a valid
    stride-1 conv becomes  out2d = sum_kh  x2d[kh:kh+Ho, :] @ wb[kh]  on
    activations flattened row-wise as (H, W*C).

    wb[kh][(w + kw)*Cin + ci, w*Cout + co] = w_hwio[kh, kw, ci, co]
    """
    kh, kw, cin, cout = w_hwio.shape
    wo = w_in - kw + 1
    # shift[k, p, w] = 1  iff  p == w + k   (p: input column, w: output column)
    shift = jax.nn.one_hot(jnp.arange(wo)[None, :] + jnp.arange(kw)[:, None],
                           w_in, dtype=w_hwio.dtype)         # (kw, wo, w_in)
    shift = jnp.transpose(shift, (0, 2, 1))                   # (kw, w_in, wo)
    wb = jnp.einsum("kpw,hkio->hpiwo", shift, w_hwio)         # (kh,w_in,cin,wo,cout)
    return wb.reshape(kh, w_in * cin, wo * cout)


def init_lksnet_params(key, in_channels=3, channels=(4, 6, 8),
                       kernel_sizes=(5, 3, 3), num_classes=1000):
    """Deterministic synthetic parameters.  BatchNorm (eval mode) is folded
    into the conv weight / bias:
        scale = gamma / sqrt(running_var + eps)
        w'    = w * scale            (per output channel)
        b'    = (conv_bias - running_mean) * scale + beta
    """
    eps = 1e-5
    conv_params = []
    c_in = in_channels
    for c_out, k in zip(channels, kernel_sizes):
        key, k1, k2, k3, k4, k5, k6 = jax.random.split(key, 7)
        w = jax.random.normal(k1, (k, k, c_in, c_out), jnp.float32) * 0.1
        conv_b = jax.random.normal(k2, (c_out,), jnp.float32) * 0.1
        gamma = 1.0 + 0.1 * jax.random.normal(k3, (c_out,), jnp.float32)
        beta = 0.1 * jax.random.normal(k4, (c_out,), jnp.float32)
        mean = 0.1 * jax.random.normal(k5, (c_out,), jnp.float32)
        var = jnp.abs(jax.random.normal(k6, (c_out,), jnp.float32)) + 0.5
        scale = gamma / jnp.sqrt(var + eps)
        w_folded = w * scale
        b_folded = (conv_b - mean) * scale + beta
        conv_params.append((w_folded, b_folded))
        c_in = c_out
    key, kf1, kf2 = jax.random.split(key, 3)
    fc_w = jax.random.normal(kf1, (c_in, num_classes), jnp.float32) * 0.1
    fc_b = jax.random.normal(kf2, (num_classes,), jnp.float32) * 0.1
    return conv_params, (fc_w, fc_b)


# ------------------------------ forward --------------------------------------

def _pick_batch_tile(n, img_h, max_rows=128):
    """Largest Bt with n % Bt == 0, Bt*H <= max_rows, and >= 2 grid steps
    whenever n >= 2 (keeps both v7x TensorCores busy)."""
    best = 1
    for bt in range(1, n + 1):
        if n % bt or bt * img_h > max_rows:
            continue
        if n >= 2 and n // bt < 2:
            continue
        best = bt
    return best


def lksnet_forward(x_nchw, conv_params, fc_params, kernel_sizes):
    """LKSNet forward.  x_nchw: (N, C, H, W) like PyTorch.  Returns (N, 1000)."""
    x = jnp.transpose(x_nchw, (0, 2, 3, 1)).astype(jnp.float32)   # NHWC
    n, h, w, c = x.shape

    # Lane-dense, row-stacked input: (N*H, ru128(W*C)), zero-padded lanes.
    lanes0 = _ru128(w * c)
    x2d = jnp.zeros((n, h, lanes0), jnp.float32).at[:, :, : w * c].set(
        x.reshape(n, h, w * c))
    x_stacked = x2d.reshape(n * h, lanes0)

    # ---- pack conv weights: banded, BN-folded, fused over K, 128-lane padded
    packed = []                       # [(fused banded weight bf16, bias f32)]
    h_cur, w_cur, c_cur, lanes_in = h, w, c, lanes0
    for (w_hwio, b), k in zip(conv_params, kernel_sizes):
        c_out = w_hwio.shape[-1]
        ho, wo = h_cur - k + 1, w_cur - k + 1
        lanes_out = _ru128(wo * c_out)
        wb = _band_conv_weight(w_hwio, w_cur)          # (k, w_cur*c_cur, wo*c_out)
        wb_p = jnp.zeros((k, lanes_in, lanes_out), jnp.float32)
        wb_p = wb_p.at[:, : w_cur * c_cur, : wo * c_out].set(wb)
        wb_p = wb_p.reshape(k * lanes_in, lanes_out).astype(jnp.bfloat16)
        bias_p = jnp.zeros((1, lanes_out), jnp.float32)
        bias_p = bias_p.at[0, : wo * c_out].set(jnp.tile(b, wo))
        packed.append((wb_p, bias_p))
        h_cur, w_cur, c_cur, lanes_in = ho, wo, c_out, lanes_out

    # ---- batch tile, pooling matrix, FC (pool scale folded, classes padded) -
    bt = _pick_batch_tile(n, h)
    num_steps = n // bt
    rows = jnp.arange(bt * h)
    pool_mat = ((rows[None, :] // h == jnp.arange(bt)[:, None])
                & (rows[None, :] % h < h_cur)).astype(jnp.float32)   # (bt, bt*h)

    fc_w, fc_b = fc_params                                 # (C_L, ncls), (ncls,)
    num_classes = fc_w.shape[1]
    ncls_pad = _ru128(num_classes)                         # 1000 -> 1024
    inv_pool = 1.0 / float(h_cur * w_cur)
    fcw_full = jnp.zeros((lanes_in, ncls_pad), jnp.float32)
    fcw_full = fcw_full.at[: w_cur * c_cur, :num_classes].set(
        jnp.tile(fc_w * inv_pool, (w_cur, 1)))             # row = w*C_L + ci
    fcw_bf = fcw_full.astype(jnp.bfloat16)
    fcb_pad = jnp.zeros((1, ncls_pad), jnp.float32).at[0, :num_classes].set(fc_b)

    # ---- single fused pallas_call: grid over batch tiles --------------------
    kernel = functools.partial(_lksnet_kernel, kernel_sizes=tuple(kernel_sizes))
    conv_args = [a for pair in packed for a in pair]

    in_specs = [pl.BlockSpec((bt * h, lanes0), lambda i: (i, 0))]
    for wb_p, bias_p in packed:                            # grid-invariant weights
        in_specs.append(pl.BlockSpec(wb_p.shape, lambda i: (0, 0)))
        in_specs.append(pl.BlockSpec(bias_p.shape, lambda i: (0, 0)))
    in_specs.append(pl.BlockSpec(pool_mat.shape, lambda i: (0, 0)))
    in_specs.append(pl.BlockSpec(fcw_bf.shape, lambda i: (0, 0)))
    in_specs.append(pl.BlockSpec(fcb_pad.shape, lambda i: (0, 0)))

    out = pl.pallas_call(
        kernel,
        out_shape=jax.ShapeDtypeStruct((num_steps, bt, ncls_pad), jnp.float32),
        grid=(num_steps,),
        in_specs=in_specs,
        out_specs=pl.BlockSpec((1, bt, ncls_pad), lambda i: (i, 0, 0)),
        compiler_params=pltpu.CompilerParams(
            dimension_semantics=("parallel",)),   # v7x: batch tiles over 2 TCs
    )(x_stacked, *conv_args, pool_mat, fcw_bf, fcb_pad)

    return out.reshape(n, ncls_pad)[:, :num_classes]


# ------------------------------ reference ------------------------------------

def lksnet_reference(x_nchw, conv_params, fc_params):
    """Pure-JAX (XLA) reference with identical folded-BN semantics."""
    x = jnp.transpose(x_nchw, (0, 2, 3, 1)).astype(jnp.float32)
    for w_hwio, b in conv_params:
        x = jax.lax.conv_general_dilated(
            x, w_hwio, window_strides=(1, 1), padding="VALID",
            dimension_numbers=("NHWC", "HWIO", "NHWC"),
            precision=jax.lax.Precision.HIGHEST)
        x = jnp.maximum(x + b, 0.0)
    pooled = jnp.mean(x, axis=(1, 2))
    fc_w, fc_b = fc_params
    return jnp.dot(pooled, fc_w, precision=jax.lax.Precision.HIGHEST) + fc_b


# ------------------------------ main ------------------------------------------

if __name__ == "__main__":
    key = jax.random.PRNGKey(0)
    kx, kp = jax.random.split(key)
    # Small LKSNet config via constructor args (the default 39/27/15 kernels
    # would need >=79x79 inputs): channels=[4,6,8], kernel_sizes=[5,3,3],
    # strides=[1,1,1], paddings=[0,0,0].  Batch 8 -> batch tile 4, grid=(2,).
    kernel_sizes = (5, 3, 3)
    channels = (4, 6, 8)
    x = jax.random.normal(kx, (8, 3, 16, 16), jnp.float32)   # NCHW, like PyTorch
    conv_params, fc_params = init_lksnet_params(
        kp, in_channels=3, channels=channels, kernel_sizes=kernel_sizes,
        num_classes=1000)

    out = lksnet_forward(x, conv_params, fc_params, kernel_sizes)
    jax.block_until_ready(out)
    assert out.shape == (8, 1000) and out.dtype == jnp.float32

    ref = lksnet_reference(x, conv_params, fc_params)
    err = float(jnp.max(jnp.abs(out - ref)))
    assert err < 5e-2, f"kernel vs reference mismatch: max abs err = {err}"
    print("KERNEL_OK")
</pallas_src>

<mosaic_0001>
module attributes {stable_mosaic.version = 11 : i64} {
  func.func @_lksnet_kernel(%arg0: i32, %arg1: memref<64x128xf32, #tpu.memory_space<vmem>>, %arg2: memref<640x128xbf16, #tpu.memory_space<vmem>>, %arg3: memref<1x128xf32, #tpu.memory_space<vmem>>, %arg4: memref<384x128xbf16, #tpu.memory_space<vmem>>, %arg5: memref<1x128xf32, #tpu.memory_space<vmem>>, %arg6: memref<384x128xbf16, #tpu.memory_space<vmem>>, %arg7: memref<1x128xf32, #tpu.memory_space<vmem>>, %arg8: memref<4x64xf32, #tpu.memory_space<vmem>>, %arg9: memref<128x1024xbf16, #tpu.memory_space<vmem>>, %arg10: memref<1x1024xf32, #tpu.memory_space<vmem>>, %arg11: memref<1x4x1024xf32, #tpu.memory_space<vmem>>) attributes {dimension_semantics = [#tpu.dimension_semantics<parallel>], iteration_bounds = array<i64: 2>, scalar_prefetch = 0 : i64, scratch_operands = 0 : i64, tpu.core_type = #tpu.core_type<tc>, window_params = [{transform_indices = @transform_0, window_bounds = array<i64: 64, 128>}, {pipeline_mode = #tpu.pipeline_mode<synchronous>, transform_indices = @transform_1, window_bounds = array<i64: 640, 128>}, {pipeline_mode = #tpu.pipeline_mode<synchronous>, transform_indices = @transform_2, window_bounds = array<i64: 1, 128>}, {pipeline_mode = #tpu.pipeline_mode<synchronous>, transform_indices = @transform_3, window_bounds = array<i64: 384, 128>}, {pipeline_mode = #tpu.pipeline_mode<synchronous>, transform_indices = @transform_4, window_bounds = array<i64: 1, 128>}, {pipeline_mode = #tpu.pipeline_mode<synchronous>, transform_indices = @transform_5, window_bounds = array<i64: 384, 128>}, {pipeline_mode = #tpu.pipeline_mode<synchronous>, transform_indices = @transform_6, window_bounds = array<i64: 1, 128>}, {pipeline_mode = #tpu.pipeline_mode<synchronous>, transform_indices = @transform_7, window_bounds = array<i64: 4, 64>}, {pipeline_mode = #tpu.pipeline_mode<synchronous>, transform_indices = @transform_8, window_bounds = array<i64: 128, 1024>}, {pipeline_mode = #tpu.pipeline_mode<synchronous>, transform_indices = @transform_9, window_bounds = array<i64: 1, 1024>}, {transform_indices = @transform_10, window_bounds = array<i64: 1, 4, 1024>}]} {
    %c0 = arith.constant 0 : index
    %c0_0 = arith.constant 0 : index
    %0 = vector.load %arg1[%c0, %c0_0] : memref<64x128xf32, #tpu.memory_space<vmem>>, vector<64x128xf32>
    %1 = arith.truncf %0 : vector<64x128xf32> to vector<64x128xbf16>
    %2 = vector.extract_strided_slice %1 {offsets = [1, 0], sizes = [63, 128], strides = [1, 1]} : vector<64x128xbf16> to vector<63x128xbf16>
    %3 = vector.extract_strided_slice %1 {offsets = [0, 0], sizes = [1, 128], strides = [1, 1]} : vector<64x128xbf16> to vector<1x128xbf16>
    %4 = tpu.concatenate %2, %3 in 0 : vector<63x128xbf16>, vector<1x128xbf16> -> vector<64x128xbf16>
    %5 = vector.extract_strided_slice %1 {offsets = [2, 0], sizes = [62, 128], strides = [1, 1]} : vector<64x128xbf16> to vector<62x128xbf16>
    %6 = vector.extract_strided_slice %1 {offsets = [0, 0], sizes = [2, 128], strides = [1, 1]} : vector<64x128xbf16> to vector<2x128xbf16>
    %7 = tpu.concatenate %5, %6 in 0 : vector<62x128xbf16>, vector<2x128xbf16> -> vector<64x128xbf16>
    %8 = vector.extract_strided_slice %1 {offsets = [3, 0], sizes = [61, 128], strides = [1, 1]} : vector<64x128xbf16> to vector<61x128xbf16>
    %9 = vector.extract_strided_slice %1 {offsets = [0, 0], sizes = [3, 128], strides = [1, 1]} : vector<64x128xbf16> to vector<3x128xbf16>
    %10 = tpu.concatenate %8, %9 in 0 : vector<61x128xbf16>, vector<3x128xbf16> -> vector<64x128xbf16>
    %11 = vector.extract_strided_slice %1 {offsets = [4, 0], sizes = [60, 128], strides = [1, 1]} : vector<64x128xbf16> to vector<60x128xbf16>
    %12 = vector.extract_strided_slice %1 {offsets = [0, 0], sizes = [4, 128], strides = [1, 1]} : vector<64x128xbf16> to vector<4x128xbf16>
    %13 = tpu.concatenate %11, %12 in 0 : vector<60x128xbf16>, vector<4x128xbf16> -> vector<64x128xbf16>
    %14 = tpu.concatenate %1, %4, %7, %10, %13 in 1 : vector<64x128xbf16>, vector<64x128xbf16>, vector<64x128xbf16>, vector<64x128xbf16>, vector<64x128xbf16> -> vector<64x640xbf16>
    %c0_1 = arith.constant 0 : index
    %c0_2 = arith.constant 0 : index
    %15 = vector.load %arg2[%c0_1, %c0_2] : memref<640x128xbf16, #tpu.memory_space<vmem>>, vector<640x128xbf16>
    %cst = arith.constant dense<0.000000e+00> : vector<64x128xf32>
    %16 = tpu.matmul %14, %15, %cst {dimension_numbers = #tpu.dot_dimension_numbers<[1], [0], [0], [1], [0, 0, 1, 1], [], []>} : vector<64x640xbf16>, vector<640x128xbf16>, vector<64x128xf32> -> vector<64x128xf32>
    %c0_3 = arith.constant 0 : index
    %c0_4 = arith.constant 0 : index
    %17 = vector.load %arg3[%c0_3, %c0_4] : memref<1x128xf32, #tpu.memory_space<vmem>>, vector<1x128xf32>
    %18 = vector.broadcast %17 : vector<1x128xf32> to vector<64x128xf32>
    %19 = arith.addf %16, %18 : vector<64x128xf32>
    %cst_5 = arith.constant 0.000000e+00 : f32
    %20 = vector.broadcast %cst_5 : f32 to vector<64x128xf32>
    %21 = arith.maximumf %19, %20 : vector<64x128xf32>
    %22 = arith.truncf %21 : vector<64x128xf32> to vector<64x128xbf16>
    %23 = vector.extract_strided_slice %22 {offsets = [1, 0], sizes = [63, 128], strides = [1, 1]} : vector<64x128xbf16> to vector<63x128xbf16>
    %24 = vector.extract_strided_slice %22 {offsets = [0, 0], sizes = [1, 128], strides = [1, 1]} : vector<64x128xbf16> to vector<1x128xbf16>
    %25 = tpu.concatenate %23, %24 in 0 : vector<63x128xbf16>, vector<1x128xbf16> -> vector<64x128xbf16>
    %26 = vector.extract_strided_slice %22 {offsets = [2, 0], sizes = [62, 128], strides = [1, 1]} : vector<64x128xbf16> to vector<62x128xbf16>
    %27 = vector.extract_strided_slice %22 {offsets = [0, 0], sizes = [2, 128], strides = [1, 1]} : vector<64x128xbf16> to vector<2x128xbf16>
    %28 = tpu.concatenate %26, %27 in 0 : vector<62x128xbf16>, vector<2x128xbf16> -> vector<64x128xbf16>
    %29 = tpu.concatenate %22, %25, %28 in 1 : vector<64x128xbf16>, vector<64x128xbf16>, vector<64x128xbf16> -> vector<64x384xbf16>
    %c0_6 = arith.constant 0 : index
    %c0_7 = arith.constant 0 : index
    %30 = vector.load %arg4[%c0_6, %c0_7] : memref<384x128xbf16, #tpu.memory_space<vmem>>, vector<384x128xbf16>
    %cst_8 = arith.constant dense<0.000000e+00> : vector<64x128xf32>
    %31 = tpu.matmul %29, %30, %cst_8 {dimension_numbers = #tpu.dot_dimension_numbers<[1], [0], [0], [1], [0, 0, 1, 1], [], []>} : vector<64x384xbf16>, vector<384x128xbf16>, vector<64x128xf32> -> vector<64x128xf32>
    %c0_9 = arith.constant 0 : index
    %c0_10 = arith.constant 0 : index
    %32 = vector.load %arg5[%c0_9, %c0_10] : memref<1x128xf32, #tpu.memory_space<vmem>>, vector<1x128xf32>
    %33 = vector.broadcast %32 : vector<1x128xf32> to vector<64x128xf32>
    %34 = arith.addf %31, %33 : vector<64x128xf32>
    %cst_11 = arith.constant 0.000000e+00 : f32
    %35 = vector.broadcast %cst_11 : f32 to vector<64x128xf32>
    %36 = arith.maximumf %34, %35 : vector<64x128xf32>
    %37 = arith.truncf %36 : vector<64x128xf32> to vector<64x128xbf16>
    %38 = vector.extract_strided_slice %37 {offsets = [1, 0], sizes = [63, 128], strides = [1, 1]} : vector<64x128xbf16> to vector<63x128xbf16>
    %39 = vector.extract_strided_slice %37 {offsets = [0, 0], sizes = [1, 128], strides = [1, 1]} : vector<64x128xbf16> to vector<1x128xbf16>
    %40 = tpu.concatenate %38, %39 in 0 : vector<63x128xbf16>, vector<1x128xbf16> -> vector<64x128xbf16>
    %41 = vector.extract_strided_slice %37 {offsets = [2, 0], sizes = [62, 128], strides = [1, 1]} : vector<64x128xbf16> to vector<62x128xbf16>
    %42 = vector.extract_strided_slice %37 {offsets = [0, 0], sizes = [2, 128], strides = [1, 1]} : vector<64x128xbf16> to vector<2x128xbf16>
    %43 = tpu.concatenate %41, %42 in 0 : vector<62x128xbf16>, vector<2x128xbf16> -> vector<64x128xbf16>
    %44 = tpu.concatenate %37, %40, %43 in 1 : vector<64x128xbf16>, vector<64x128xbf16>, vector<64x128xbf16> -> vector<64x384xbf16>
    %c0_12 = arith.constant 0 : index
    %c0_13 = arith.constant 0 : index
    %45 = vector.load %arg6[%c0_12, %c0_13] : memref<384x128xbf16, #tpu.memory_space<vmem>>, vector<384x128xbf16>
    %cst_14 = arith.constant dense<0.000000e+00> : vector<64x128xf32>
    %46 = tpu.matmul %44, %45, %cst_14 {dimension_numbers = #tpu.dot_dimension_numbers<[1], [0], [0], [1], [0, 0, 1, 1], [], []>} : vector<64x384xbf16>, vector<384x128xbf16>, vector<64x128xf32> -> vector<64x128xf32>
    %c0_15 = arith.constant 0 : index
    %c0_16 = arith.constant 0 : index
    %47 = vector.load %arg7[%c0_15, %c0_16] : memref<1x128xf32, #tpu.memory_space<vmem>>, vector<1x128xf32>
    %48 = vector.broadcast %47 : vector<1x128xf32> to vector<64x128xf32>
    %49 = arith.addf %46, %48 : vector<64x128xf32>
    %cst_17 = arith.constant 0.000000e+00 : f32
    %50 = vector.broadcast %cst_17 : f32 to vector<64x128xf32>
    %51 = arith.maximumf %49, %50 : vector<64x128xf32>
    %c0_18 = arith.constant 0 : index
    %c0_19 = arith.constant 0 : index
    %52 = vector.load %arg8[%c0_18, %c0_19] : memref<4x64xf32, #tpu.memory_space<vmem>>, vector<4x64xf32>
    %cst_20 = arith.constant dense<0.000000e+00> : vector<4x128xf32>
    %53 = tpu.matmul %52, %51, %cst_20 {dimension_numbers = #tpu.dot_dimension_numbers<[1], [0], [0], [1], [0, 0, 1, 1], [], []>} : vector<4x64xf32>, vector<64x128xf32>, vector<4x128xf32> -> vector<4x128xf32>
    %54 = arith.truncf %53 : vector<4x128xf32> to vector<4x128xbf16>
    %c0_21 = arith.constant 0 : index
    %c0_22 = arith.constant 0 : index
    %55 = vector.load %arg9[%c0_21, %c0_22] : memref<128x1024xbf16, #tpu.memory_space<vmem>>, vector<128x1024xbf16>
    %cst_23 = arith.constant dense<0.000000e+00> : vector<4x1024xf32>
    %56 = tpu.matmul %54, %55, %cst_23 {dimension_numbers = #tpu.dot_dimension_numbers<[1], [0], [0], [1], [0, 0, 1, 1], [], []>} : vector<4x128xbf16>, vector<128x1024xbf16>, vector<4x1024xf32> -> vector<4x1024xf32>
    %c0_24 = arith.constant 0 : index
    %c0_25 = arith.constant 0 : index
    %57 = vector.load %arg10[%c0_24, %c0_25] : memref<1x1024xf32, #tpu.memory_space<vmem>>, vector<1x1024xf32>
    %58 = vector.broadcast %57 : vector<1x1024xf32> to vector<4x1024xf32>
    %59 = arith.addf %56, %58 : vector<4x1024xf32>
    %60 = vector.shape_cast %59 : vector<4x1024xf32> to vector<1x4x1024xf32>
    %c0_26 = arith.constant 0 : index
    %c0_27 = arith.constant 0 : index
    %c0_28 = arith.constant 0 : index
    %61 = vector.load %arg11[%c0_26, %c0_27, %c0_28] : memref<1x4x1024xf32, #tpu.memory_space<vmem>>, vector<1x4x1024xf32>
    tpu.vector_store %arg11[%c0_26, %c0_27, %c0_28], %60 {strides = array<i32>} : memref<1x4x1024xf32, #tpu.memory_space<vmem>>, vector<1x4x1024xf32>,
    return
  }
  func.func @transform_0(%arg0: i32) -> (i32, i32) {
    %c0_i32 = arith.constant 0 : i32
    %c0_i32_0 = arith.constant 0 : i32
    return %arg0, %c0_i32 : i32, i32
  }
  func.func @transform_1(%arg0: i32) -> (i32, i32) {
    %c0_i32 = arith.constant 0 : i32
    %c0_i32_0 = arith.constant 0 : i32
    %c0_i32_1 = arith.constant 0 : i32
    return %c0_i32, %c0_i32_0 : i32, i32
  }
  func.func @transform_2(%arg0: i32) -> (i32, i32) {
    %c0_i32 = arith.constant 0 : i32
    %c0_i32_0 = arith.constant 0 : i32
    %c0_i32_1 = arith.constant 0 : i32
    return %c0_i32, %c0_i32_0 : i32, i32
  }
  func.func @transform_3(%arg0: i32) -> (i32, i32) {
    %c0_i32 = arith.constant 0 : i32
    %c0_i32_0 = arith.constant 0 : i32
    %c0_i32_1 = arith.constant 0 : i32
    return %c0_i32, %c0_i32_0 : i32, i32
  }
  func.func @transform_4(%arg0: i32) -> (i32, i32) {
    %c0_i32 = arith.constant 0 : i32
    %c0_i32_0 = arith.constant 0 : i32
    %c0_i32_1 = arith.constant 0 : i32
    return %c0_i32, %c0_i32_0 : i32, i32
  }
  func.func @transform_5(%arg0: i32) -> (i32, i32) {
    %c0_i32 = arith.constant 0 : i32
    %c0_i32_0 = arith.constant 0 : i32
    %c0_i32_1 = arith.constant 0 : i32
    return %c0_i32, %c0_i32_0 : i32, i32
  }
  func.func @transform_6(%arg0: i32) -> (i32, i32) {
    %c0_i32 = arith.constant 0 : i32
    %c0_i32_0 = arith.constant 0 : i32
    %c0_i32_1 = arith.constant 0 : i32
    return %c0_i32, %c0_i32_0 : i32, i32
  }
  func.func @transform_7(%arg0: i32) -> (i32, i32) {
    %c0_i32 = arith.constant 0 : i32
    %c0_i32_0 = arith.constant 0 : i32
    %c0_i32_1 = arith.constant 0 : i32
    return %c0_i32, %c0_i32_0 : i32, i32
  }
  func.func @transform_8(%arg0: i32) -> (i32, i32) {
    %c0_i32 = arith.constant 0 : i32
    %c0_i32_0 = arith.constant 0 : i32
    %c0_i32_1 = arith.constant 0 : i32
    return %c0_i32, %c0_i32_0 : i32, i32
  }
  func.func @transform_9(%arg0: i32) -> (i32, i32) {
    %c0_i32 = arith.constant 0 : i32
    %c0_i32_0 = arith.constant 0 : i32
    %c0_i32_1 = arith.constant 0 : i32
    return %c0_i32, %c0_i32_0 : i32, i32
  }
  func.func @transform_10(%arg0: i32) -> (i32, i32, i32) {
    %c0_i32 = arith.constant 0 : i32
    %c0_i32_0 = arith.constant 0 : i32
    %c0_i32_1 = arith.constant 0 : i32
    return %arg0, %c0_i32, %c0_i32_0 : i32, i32, i32
  }
}

</mosaic_0001>

<bundles_post_ra>
// kernel: tpu_custom_call.1
= control target key start
LH: loop header
LB: loop body
LE: loop exit
PB: predicated region body
PF: predicated region fallthrough
CT: control target
= control target key end

     0   :  { %s4074_s0 = inlined_call_operand.hbm [shape: f32[128,128], index: 0, kind: input, shape index: {}]   ;;  %s4075_s1 = inlined_call_operand.hbm [shape: bf16[640,128], index: 1, kind: input, shape index: {}]   ;;  %s4076_s2 = inlined_call_operand.vmem [shape: f32[1,128], index: 2, kind: input, shape index: {}]   ;;  %s4077_s3 = inlined_call_operand.hbm [shape: bf16[384,128], index: 3, kind: input, shape index: {}]   ;;  %s4078_s4 = inlined_call_operand.vmem [shape: f32[1,128], index: 4, kind: input, shape index: {}]   ;;  %s4079_s5 = inlined_call_operand.hbm [shape: bf16[384,128], index: 5, kind: input, shape index: {}]   ;;  %s4080_s6 = inlined_call_operand.vmem [shape: f32[1,128], index: 6, kind: input, shape index: {}]   ;;  %s4081_s7 = inlined_call_operand.vmem [shape: f32[4,64], index: 7, kind: input, shape index: {}]   ;;  %s4082_s8 = inlined_call_operand.hbm [shape: bf16[128,1024], index: 8, kind: input, shape index: {}]   ;;  %s4083_s9 = inlined_call_operand.vmem [shape: f32[1,1024], index: 9, kind: input, shape index: {}]   ;;  %s4084_s10 = inlined_call_operand.hbm [shape: f32[2,4,1024], index: 10, kind: output, shape index: {}]  }
   0x1   :  { %4091 = sst [smem:[#allocation18_spill]] %s4083_s9 }
   0x2   :  { %4092 = sst [smem:[#allocation19_spill]] %s4084_s10 }
   0x3   :  { %15 = vsyncpa [#allocation3], 0 }
   0x4   :  { %17 = vsyncpa [#allocation3 + $0x1], 0 }
   0x5   :  { %18 = vsyncpa [#allocation6], 0 }
   0x6   :  { %19 = vsyncpa [#allocation9], 0 }
   0x7   :  { %20 = vsyncpa [#allocation4], 0 }
   0x8   :  { %22 = vsyncpa [#allocation4 + $0x1], 0  ;;  %s3642_s13 = smov 0   ;;  %s3644_s14 = smov 0  }
   0x9   :  { %s3646_s15 = smov 0   ;;  %s3648_s16 = smov 0  }
   0xa LB: > { %4093 = sst [smem:[#allocation16_spill]] %s3557_s13  ;;  %s3663_s17 = sadd.s32 4294967295, %s3569_s16   ;;  %s3569_s16 = sphi %s3648_s16, %s4122_s16   ;;  %s3565_s15 = sphi %s3646_s15, %s4121_s15   ;;  %s3561_s14 = sphi %s3644_s14, %s4120_s14   ;;  %s3557_s13 = sphi %s3642_s13, %s4119_s13  }
   0xb   : > { %s2680_s18 = sadd.s32 4294967294, %s3569_s16   ;;  %p48_p0 = scmp.ne.s32.totalorder %s3561_s14, %s3557_s13 }
   0xc   : > { %p4085_p1 = scmp.eq.s32.totalorder %s3663_s17, 0  ;;  %p267_p3 = scmp.eq.s32.totalorder %s2680_s18, 1 }
   0xd   : > { %p2681_p5 = scmp.ge.s32.totalorder %s3569_s16, 1  ;;  %p274_p7 = scmp.lt.s32.totalorder %s3569_s16, 3 }
   0xe   : > { %p3672_p4 = por %p4085_p1, %p48_p0  ;;  %p3677_p6 = por %p267_p3, %p48_p0 }
   0xf   : > { %p3682_p8 = pnand %p2681_p5, %p274_p7  ;;  %s3571_s22 = smov [#allocation5]  }
  0x10   : > { %s4094_s19 = scalar_select %p3672_p4, 1, 0 }
  0x11   : > { %s4095_s20 = scalar_select %p3677_p6, 1, 0 }
  0x12   : > { %s4097_s21 = scalar_select %p3682_p8, 1, 0 }
  0x13   : > { %4096 = sst [smem:[#allocation17_spill]] %s4095_s20  ;;  %s286_s23 = sshll.u32 %s3571_s22, 4  ;;  %s3686_s23 = int_to_ptr.vmem [resolvable:$true] %s286_s23 }
  0x14   : > { %p3188_p9 = pneg %p3682_p8  ;;  %s3572_s25 = smov [#allocation8]  }
  0x15   : > { %s318_s26 = sshll.u32 %s3572_s25, 4  ;;  %s3573_s27 = smov [#allocation7]   ;;  %s3697_s26 = int_to_ptr.vmem [resolvable:$true] %s318_s26 }
  0x16   : > { %p3693_p11 = pnand %p3188_p9, %p4085_p1  ;;  %s3699_s28 = sshll.u32 %s3573_s27, 4  ;;  %s303_s28 = int_to_ptr.vmem [resolvable:$true] %s3699_s28 }
  0x17   : > { %s3353_s11 = scalar_lea.hbm %s4075_s1, 5120 }
  0x18   : > { %p3354_p12 = scmp.ne.s32.totalorder %s4075_s1, %s3353_s11  ;;  %p3709_p13 = pneg %p3693_p11 }
  0x19   : > { %p3360_p5 = scmp.lt.u32.totalorder %s3353_s11, %s4075_s1 }
  0x1a   : > { %p3356_p0 = pnand %p3709_p13, %p3354_p12 }
  0x1c   : > { %p3357_p3 = pneg %p3356_p0 }
  0x1e   : > { %p3362_p7 = pnand %p3360_p5, %p3357_p3 }
  0x20   : > { %3365 = shalt.err (!%p3362_p7)
}
  0x21   : > { %s3366_s29 = scalar_lea.vmem %s3686_s23, 5120  ;;  %p3374_p2 = scmp.lt.s32.totalorder %s3686_s23, %s3686_s23 }
  0x22   : > { %p3367_p9 = scmp.ne.s32.totalorder %s3686_s23, %s3366_s29  ;;  %p3375_p6 = scmp.lt.s32.totalorder %s3366_s29, %s3366_s29 }
  0x24   : > { %p3369_p10 = pnand %p3367_p9, %p3709_p13  ;;  %p3376_p12 = por %p3375_p6, %p3374_p2 }
  0x26   : > { %p3370_p1 = pneg %p3369_p10 }
  0x28   : > { %p3377_p0 = pnand %p3376_p12, %p3370_p1 }
  0x2a   : > { %3380 = shalt.err (!%p3377_p0)
}
  0x2b   : > { %s3574_s30 = smov 64   ;;  %s3575_s11 = smov 4  }
  0x2c   : > { %3191 = dma.hbm_to_vmem [thread:$0]  (!%p3693_p11), %s4075_s1, 5120, %s3686_s23, [#allocation6], %s3574_s30, %s3574_s30, %s3575_s11  }
  0x2d   : > { %s3381_s29 = scalar_lea.hbm %s4079_s5, 3072 }
  0x2e   : > { %p3382_p1 = scmp.ne.s32.totalorder %s4079_s5, %s3381_s29  ;;  %p3388_p10 = scmp.lt.u32.totalorder %s3381_s29, %s4079_s5 }
  0x30   : > { %p3384_p2 = pnand %p3382_p1, %p3709_p13 }
  0x32   : > { %p3385_p6 = pneg %p3384_p2 }
  0x34   : > { %p3390_p3 = pnand %p3388_p10, %p3385_p6 }
  0x36   : > { %3393 = shalt.err (!%p3390_p3)
}
  0x37   : > { %s3394_s23 = scalar_lea.vmem %s3697_s26, 3072  ;;  %p3402_p12 = scmp.lt.s32.totalorder %s3697_s26, %s3697_s26 }
  0x38   : > { %p3395_p5 = scmp.ne.s32.totalorder %s3697_s26, %s3394_s23  ;;  %p3403_p0 = scmp.lt.s32.totalorder %s3394_s23, %s3394_s23 }
  0x3a   : > { %p3397_p7 = pnand %p3395_p5, %p3709_p13  ;;  %p3404_p1 = por %p3403_p0, %p3402_p12 }
  0x3c   : > { %p3398_p9 = pneg %p3397_p7 }
  0x3e   : > { %p3405_p2 = pnand %p3404_p1, %p3398_p9 }
  0x40   : > { %3408 = shalt.err (!%p3405_p2)
}
  0x41   : > { %3197 = dma.hbm_to_vmem [thread:$0]  (!%p3693_p11), %s4079_s5, 3072, %s3697_s26, [#allocation9], %s3574_s30, %s3574_s30, %s3575_s11  }
  0x42   : > { %s3409_s12 = scalar_lea.hbm %s4077_s3, 3072 }
  0x43   : > { %p3410_p6 = scmp.ne.s32.totalorder %s4077_s3, %s3409_s12  ;;  %p3416_p5 = scmp.lt.u32.totalorder %s3409_s12, %s4077_s3 }
  0x45   : > { %p3412_p10 = pnand %p3410_p6, %p3709_p13 }
  0x47   : > { %p3413_p3 = pneg %p3412_p10 }
  0x49   : > { %p3418_p7 = pnand %p3416_p5, %p3413_p3 }
  0x4b   : > { %3421 = shalt.err (!%p3418_p7)
}
  0x4c   : > { %s3422_s23 = scalar_lea.vmem %s303_s28, 3072  ;;  %p3430_p1 = scmp.lt.s32.totalorder %s303_s28, %s303_s28 }
  0x4d   : > { %p3423_p9 = scmp.ne.s32.totalorder %s303_s28, %s3422_s23  ;;  %p3431_p2 = scmp.lt.s32.totalorder %s3422_s23, %s3422_s23 }
  0x4f   : > { %p3425_p12 = pnand %p3423_p9, %p3709_p13  ;;  %p3432_p4 = por %p3431_p2, %p3430_p1 }
  0x51   : > { %p3426_p0 = pneg %p3425_p12 }
  0x53   : > { %p3433_p8 = pnand %p3432_p4, %p3426_p0 }
  0x55   : > { %3436 = shalt.err (!%p3433_p8)
}
  0x56   : > { %3194 = dma.hbm_to_vmem [thread:$0]  (!%p3693_p11), %s4077_s3, 3072, %s303_s28, [#allocation6], %s3574_s30, %s3574_s30, %s3575_s11  }
  0x57   : > { %s3576_s10 = smov [#allocation10]   ;;  %s3437_s18 = scalar_lea.hbm %s4082_s8, 8192 }
  0x58   : > { %s337_s13 = sshll.u32 %s3576_s10, 4  ;;  %p3438_p4 = scmp.ne.s32.totalorder %s4082_s8, %s3437_s18  ;;  %s338_s13 = int_to_ptr.vmem [resolvable:$true] %s337_s13 }
  0x59   : > { %p3444_p10 = scmp.lt.u32.totalorder %s3437_s18, %s4082_s8 }
  0x5a   : > { %p3440_p8 = pnand %p3438_p4, %p3709_p13 }
  0x5c   : > { %p3441_p6 = pneg %p3440_p8 }
  0x5e   : > { %p3446_p3 = pnand %p3444_p10, %p3441_p6 }
  0x60   : > { %3449 = shalt.err (!%p3446_p3)
}
  0x61   : > { %s3450_s28 = scalar_lea.vmem %s338_s13, 8192  ;;  %p3458_p12 = scmp.lt.s32.totalorder %s338_s13, %s338_s13 }
  0x62   : > { %p3451_p5 = scmp.ne.s32.totalorder %s338_s13, %s3450_s28  ;;  %p3459_p0 = scmp.lt.s32.totalorder %s3450_s28, %s3450_s28 }
  0x64   : > { %p3453_p7 = pnand %p3451_p5, %p3709_p13  ;;  %p3460_p1 = por %p3459_p0, %p3458_p12 }
  0x66   : > { %p3454_p9 = pneg %p3453_p7 }
  0x68   : > { %p3461_p2 = pnand %p3460_p1, %p3454_p9 }
  0x6a   : > { %3464 = shalt.err (!%p3461_p2)
}
  0x6b   : > { %s3577_s30 = smov 512   ;;  %s3578_s22 = smov 32  }
  0x6c   : > { %3200 = dma.hbm_to_vmem [thread:$0]  (!%p3693_p11), %s4082_s8, 8192, %s338_s13, [#allocation9], %s3577_s30, %s3577_s30, %s3578_s22  }
  0x6d   : > { %s3800_s9 = sadd.s32 1, %s3569_s16   ;;  %s35_s20 = sadd.s32 1, %s3565_s15 }
  0x6e   : > { %s32_s10 = ssub.s32 %s3569_s16, %s3800_s9  ;;  %p42_p4 = scmp.ne.s32.totalorder %s3565_s15, %s3561_s14 }
  0x6f   : > { %p33_p13 = scmp.eq.s32.totalorder %s32_s10, 0  ;;  %p43_p8 = scmp.eq.s32.totalorder %s3569_s16, 0 }
  0x70   : > { %p4100_p10 = scmp.eq.s32.totalorder %s3663_s17, 1  ;;  %p3213_p5 = scmp.lt.s32.totalorder %s3569_s16, 2 }
  0x71   : > { %s3809_s12 = scalar_select %p33_p13, %s3565_s15, %s35_s20  }
  0x72   : > { %p44_p6 = por %p43_p8, %p42_p4  ;;  %p3813_p3 = por %p4100_p10, %p42_p4 }
  0x73   : > { %s354_s24 = sand.u32 1, %s3565_s15   ;;  %s2858_s13 = sshll.u32 %s3569_s16, 10 }
  0x74   : > { %s2687_s25 = sshll.u32 %s354_s24, 6  ;;  %s3823_s23 = scalar_lea.hbm %s4074_s0, %s2858_s13 }
  0x75   : > { %s358_s28 = scalar_lea.vmem [#allocation2], %s2687_s25  ;;  %p3827_p11 = pnand %p3213_p5, %p44_p6 }
  0x76   : > { %s365_s30 = sshll.u32 %s358_s28, 4  ;;  %s3831_s11 = scalar_lea.sflag [#allocation3], %s354_s24  ;;  %s3825_s30 = int_to_ptr.vmem [resolvable:$true] %s365_s30 }
  0x77   : > { %s3465_s26 = scalar_lea.hbm %s3823_s23, 1024  ;;  %p3467_p9 = pneg %p3827_p11 }
  0x78   : > { %p3466_p7 = scmp.ne.s32.totalorder %s3823_s23, %s3465_s26  ;;  %s3470_s25 = scalar_lea.hbm %s4074_s0, 2048 }
  0x79   : > { %p3471_p1 = scmp.lt.u32.totalorder %s3823_s23, %s4074_s0  ;;  %p3472_p2 = scmp.lt.u32.totalorder %s3470_s25, %s3465_s26 }
  0x7a   : > { %p3468_p12 = pnand %p3467_p9, %p3466_p7  ;;  %p3474_p4 = scmp.lt.u32.totalorder %s3465_s26, %s3823_s23 }
  0x7b   : > { %p3473_p13 = por %p3472_p2, %p3471_p1 }
  0x7c   : > { %p3469_p0 = pneg %p3468_p12 }
  0x7d   : > { %p3475_p8 = por %p3474_p4, %p3473_p13 }
  0x7f   : > { %p3476_p6 = pnand %p3475_p8, %p3469_p0 }
  0x81   : > { %3479 = shalt.err (!%p3476_p6)
}
  0x82   : > { %s3480_s24 = scalar_lea.vmem %s3825_s30, 1024  ;;  %s3579_s29 = smov [#allocation2]  }
  0x83   : > { %p3481_p10 = scmp.ne.s32.totalorder %s3825_s30, %s3480_s24  ;;  %s3485_s28 = sshll.u32 %s3579_s29, 4  ;;  %s3486_s28 = int_to_ptr.vmem [resolvable:$false] %s3485_s28 }
  0x84   : > { %s3487_s10 = scalar_lea.vmem %s3486_s28, 2048  ;;  %p3488_p12 = scmp.lt.s32.totalorder %s3825_s30, %s3486_s28 }
  0x85   : > { %p3483_p5 = pnand %p3481_p10, %p3467_p9  ;;  %p3489_p1 = scmp.lt.s32.totalorder %s3487_s10, %s3480_s24 }
  0x87   : > { %p3484_p7 = pneg %p3483_p5  ;;  %p3490_p2 = por %p3489_p1, %p3488_p12 }
  0x89   : > { %p3491_p13 = pnand %p3490_p2, %p3484_p7 }
  0x8b   : > { %3494 = shalt.err (!%p3491_p13)
}
  0x8c   : > { %s3580_s26 = smov 128   ;;  %s3581_s20 = smov 8  }
  0x8d   : > { %3204 = dma.hbm_to_vmem [thread:$0]  (!%p3827_p11), %s3823_s23, 1024, %s3825_s30, %s3831_s11, %s3580_s26, %s3580_s26, %s3581_s20  }
  0x8e   : > { %p4103_p9 = scmp.ne.s32.totalorder %s4097_s21, 0 }
  0x8f   : > { %s3862_s25 = sand.u32 (!%p4103_p9), 1, %s3561_s14   ;;  %p4104_p0 = scmp.ne.s32.totalorder (!%p4103_p9), %s4094_s19, 0 }
  0x90   : > { %377 = sbr.rel (%p4103_p9) target bundleno = 1421 (0x58d), region = 60  ;;  %s2691_s13 = sshll.u32 (!%p4103_p9), %s3862_s25, 6 }
  0x91   : > { %s380_s27 = scalar_lea.sflag (!%p4103_p9), [#allocation3], %s3862_s25  ;;  %s3866_s24 = scalar_lea.vmem (!%p4103_p9), [#allocation2], %s2691_s13 }
  0x97   : > { %3540 = dma.done.wait (%p4104_p0), %s380_s27, 1024  }
  0x98   : > { %3542 = vsyncadd (%p4104_p0), %s380_s27, 4294966272  ;;  %p4105_p11 = scmp.eq.s32.totalorder %s3663_s17, 0 }
  0x9a   : > { %3544 = dma.done.wait (%p4105_p11), [#allocation6], 8192   ;;  %p4106_p4 = pmov %p4105_p11 }
  0x9c   : > { %3546 = vsyncadd (%p4106_p4), [#allocation6], 4294959104  ;;  %p4107_p8 = pmov %p4106_p4 }
  0x9d   : > { %p4108_p6 = pmov %p4106_p4 }
  0x9e   : > { %3548 = dma.done.wait (%p4107_p8), [#allocation9], 11264  }
  0x9f   : > { %3550 = vsyncadd (%p4108_p6), [#allocation9], 4294956032  ;;  %v3265_v0 = vld [vmem:[#allocation5 + $0x40] sm:$0xff]   ;;  %v3269_v4 = vld [vmem:[#allocation5 + $0x48] sm:$0xff]   ;;  %vm450_vm0 = vsmask.f32 7424 }
  0xa0   : > { %v3266_v1 = vld [vmem:[#allocation5] sm:$0xff]   ;;  %2860 = vmatprep.subr.bf16.mxu0 %v3265_v0  ;;  %v3270_v5 = vld [vmem:[#allocation5 + $0x8] sm:$0xff]   ;;  %v3273_v8 = vld [vmem:[#allocation5 + $0x50] sm:$0xff]   ;;  %vm510_vm1 = vsmask.f32 6400  ;;  %vm494_vm2 = vcmask 1046528  }
  0xa1   : > { %v3267_v2 = vld [vmem:[#allocation5 + $0xc0] sm:$0xff]   ;;  %2861 = vmatpush3.bf16.msra.mxu0 %v3266_v1  ;;  %v3271_v6 = vld [vmem:[#allocation5 + $0xc8] sm:$0xff]   ;;  %v3274_v9 = vld [vmem:[#allocation5 + $0x10] sm:$0xff]   ;;  %vm487_vm3 = vcmask 1047552   ;;  %vm533_vm6 = vcmask 1045504   ;;  %vm3583_vm7 = vmmov 0  }
  0xa2   : > { %v3268_v3 = vld [vmem:[#allocation5 + $0x80] sm:$0xff]   ;;  %2900 = vmatprep.subr.bf16.mxu1 %v3267_v2  ;;  %2862 = vmatprep.subr.bf16.mxu0 %v3269_v4  ;;  %v3272_v7 = vld [vmem:[#allocation5 + $0x88] sm:$0xff]   ;;  %v3275_v10 = vld [vmem:[#allocation5 + $0xd0] sm:$0xff]   ;;  %vm1872_vm8 = vcmask 523264   ;;  %s4113_s20 = sld [smem:[#allocation18_spill]]  ;;  %s2696_s13 = sshll.u32 %s3862_s25, 5 }
  0xa3   : > { %2901 = vmatpush3.bf16.msra.mxu1 %v3268_v3  ;;  %v3276_v11 = vld [vmem:[#allocation5 + $0x90] sm:$0xff]   ;;  %v3277_v12 = vld [vmem:[#allocation5 + $0x58] sm:$0xff]   ;;  %v3281_v16 = vld [vmem:[#allocation5 + $0x60] sm:$0xff]   ;;  %s435_s27 = scalar_lea.vmem [#allocation11], %s2696_s13  ;;  %s4114_s30 = sld [smem:[#allocation19_spill]] }
  0xa4   : > { %2902 = vmatprep.subr.bf16.mxu1 %v3271_v6  ;;  %v3278_v13 = vld [vmem:[#allocation5 + $0x18] sm:$0xff]   ;;  %v3282_v17 = vld [vmem:[#allocation5 + $0x20] sm:$0xff]   ;;  %v3285_v20 = vld [vmem:[#allocation5 + $0x68] sm:$0xff]   ;;  %s2572_s19 = sshll.u32 %s435_s27, 4  ;;  %s3586_s29 = smov [#allocation11]   ;;  %s4032_s19 = int_to_ptr.vmem [resolvable:$true] %s2572_s19 }
  0xa5   : > { %2863 = vmatpush3.bf16.msra.mxu0 %v3270_v5  ;;  %v3279_v14 = vld [vmem:[#allocation5 + $0xd8] sm:$0xff]   ;;  %v3283_v18 = vld [vmem:[#allocation5 + $0xe0] sm:$0xff]   ;;  %v3286_v21 = vld [vmem:[#allocation5 + $0x28] sm:$0xff]   ;;  %s3495_s11 = scalar_lea.vmem %s4032_s19, 512  ;;  %s3499_s28 = sshll.u32 %s3586_s29, 4  ;;  %s3500_s28 = int_to_ptr.vmem [resolvable:$false] %s3499_s28 }
  0xa6   : > { %2864 = vmatprep.subr.bf16.mxu0 %v3273_v8  ;;  %v3280_v15 = vld [vmem:[#allocation5 + $0x98] sm:$0xff]   ;;  %v3284_v19 = vld [vmem:[#allocation5 + $0xa0] sm:$0xff]   ;;  %v3287_v22 = vld [vmem:[#allocation5 + $0xe8] sm:$0xff]   ;;  %p3496_p10 = scmp.ne.s32.totalorder %s4032_s19, %s3495_s11  ;;  %s3501_s10 = scalar_lea.vmem %s3500_s28, 1024 }
  0xa7   : > { %2903 = vmatpush3.bf16.msra.mxu1 %v3272_v7  ;;  %v3288_v23 = vld [vmem:[#allocation5 + $0xa8] sm:$0xff]   ;;  %v3289_v24 = vld [vmem:[#allocation5 + $0x70] sm:$0xff]   ;;  %v3293_v28 = vld [vmem:[#allocation5 + $0x78] sm:$0xff]   ;;  %p3502_p12 = scmp.lt.s32.totalorder %s4032_s19, %s3500_s28  ;;  %p3503_p1 = scmp.lt.s32.totalorder %s3501_s10, %s3495_s11 }
  0xa8   : > { %2904 = vmatprep.subr.bf16.mxu1 %v3275_v10  ;;  %v3290_v25 = vld [vmem:[#allocation5 + $0x30] sm:$0xff]   ;;  %v3294_v29 = vld [vmem:[#allocation5 + $0x38] sm:$0xff]   ;;  %v438_v31 = vld [vmem:[%s3866_s24] sm:$0xff]  ;;  %p3497_p5 = pnand %p3496_p10, %p3813_p3 }
  0xa9   : > { %2865 = vmatpush3.bf16.msra.mxu0 %v3274_v9  ;;  %v3291_v26 = vld [vmem:[#allocation5 + $0xf0] sm:$0xff]   ;;  %v3295_v30 = vld [vmem:[#allocation5 + $0xf8] sm:$0xff]   ;;  %v439_v32 = vld [vmem:[%s3866_s24 + $0x8] sm:$0xff]  ;;  %p3504_p2 = por %p3503_p1, %p3502_p12 }
  0xaa   : > { %2866 = vmatprep.subr.bf16.mxu0 %v3277_v12  ;;  %v3292_v27 = vld [vmem:[#allocation5 + $0xb0] sm:$0xff]   ;;  %v441_v34 = vld [vmem:[%s3866_s24 + $0x18] sm:$0xff]  ;;  %v3884_v35 = vpack.c.bf16 %v439_v32, %v438_v31  ;;  %v3297_v40 = vld [vmem:[#allocation5 + $0x100] sm:$0xff]   ;;  %p3498_p7 = pneg %p3497_p5 }
  0xab   : > { %2905 = vmatpush3.bf16.msra.mxu1 %v3276_v11  ;;  %v440_v33 = vld [vmem:[%s3866_s24 + $0x10] sm:$0xff]  ;;  %v3296_v37 = vld [vmem:[#allocation5 + $0xb8] sm:$0xff]   ;;  %v442_v48 = vld [vmem:[%s3866_s24 + $0x20] sm:$0xff] }
  0xac   : > { %2906 = vmatprep.subr.bf16.mxu1 %v3279_v14  ;;  %v3886_v36 = vpack.c.bf16 %v441_v34, %v440_v33  ;;  %v452_v38 = vshrl.u32 %v3884_v35, 16  ;;  %v454_v39 = vshll.u32 %v3884_v35, 16  ;;  %v495_v43 = vrot.slane %v3884_v35, 1  ;;  %v443_v49 = vld [vmem:[%s3866_s24 + $0x28] sm:$0xff]  ;;  %v444_v58 = vld [vmem:[%s3866_s24 + $0x30] sm:$0xff]  ;;  %v445_v59 = vld [vmem:[%s3866_s24 + $0x38] sm:$0xff]  ;;  %p3505_p13 = pnand %p3504_p2, %p3498_p7 }
  0xad   : > { %2867 = vmatpush3.bf16.msra.mxu0 %v3278_v13  ;;  %v3901_v55 = vpack.c.bf16 %v443_v49, %v442_v48  ;;  %v3298_v61 = vld [vmem:[#allocation5 + $0x108] sm:$0xff]   ;;  %v3913_v2 = vpack.c.bf16 %v445_v59, %v444_v58  ;;  %v534_v3 = vrot.slane %v3884_v35, 2  ;;  %v3299_v13 = vld [vmem:[#allocation5 + $0x110] sm:$0xff]   ;;  %vm3928_vm4 = vmand %vm487_vm3, %vm450_vm0  ;;  %s2859_s24 = sshll.u32 %s3663_s17, 9  ;;  %s2558_s17 = scalar_lea.sflag [#allocation4], %s3862_s25 }
  0xae   : > { %2868 = vmatprep.subr.bf16.mxu0 %v3281_v16  ;;  %v459_v41 = vshll.u32 %v3886_v36, 16  ;;  %v463_v42 = vshrl.u32 %v3886_v36, 16  ;;  %v496_v44 = vrot.slane %v3886_v36, 1  ;;  %v3894_v45 = vrot.slane %v454_v39, 1  ;;  %vm3934_vm5 = vmand %vm494_vm2, %vm510_vm1  ;;  %v3302_v31 = vld [vmem:[#allocation5 + $0x128] sm:$0xff]   ;;  %v3303_v34 = vld [vmem:[#allocation5 + $0x130] sm:$0xff]   ;;  %s4030_s22 = scalar_lea.hbm %s4114_s30, %s2859_s24 }
  0xaf   : > { %2907 = vmatpush3.bf16.msra.mxu1 %v3280_v15  ;;  %v511_v46 = vrot.slane %v452_v38, 1  ;;  %v512_v47 = vrot.slane %v454_v39, 2  ;;  %v467_v63 = vshll.u32 %v3901_v55, 16  ;;  %v471_v0 = vshrl.u32 %v3901_v55, 16  ;;  %v3309_v48 = vld [vmem:[#allocation7 + $0x8] sm:$0xff]   ;;  %v3311_v49 = vld [vmem:[#allocation7 + $0x50] sm:$0xff]  }
  0xb0   : > { %2908 = vmatprep.subr.bf16.mxu1 %v3283_v18  ;;  %v461_v50 = vrot.slane %v459_v41, 1  ;;  %v514_v51 = vrot.slane %v463_v42, 1  ;;  %v515_v52 = vrot.slane %v459_v41, 2  ;;  %v457_v53 = vor.u32 %v3894_v45, %v452_v38  ;;  %v3304_v38 = vld [vmem:[#allocation5 + $0x138] sm:$0xff]   ;;  %v3321_v58 = vld [vmem:[#allocation7 + $0x28] sm:$0xff]  }
  0xb1   : > { %2869 = vmatpush3.bf16.msra.mxu0 %v3282_v17  ;;  %v3899_v54 = vor.u32 %v512_v47, %v511_v46  ;;  %v497_v57 = vsel %vm494_vm2, %v495_v43, %v496_v44  ;;  %v469_v4 = vrot.slane %v467_v63, 1  ;;  %v518_v5 = vrot.slane %v471_v0, 1  ;;  %v3307_v46 = vld [vmem:[#allocation7 + $0x80] sm:$0xff]   ;;  %v3308_v47 = vld [vmem:[#allocation7 + $0x48] sm:$0xff]  }
  0xb2   : > { %2870 = vmatprep.subr.bf16.mxu0 %v3285_v20  ;;  %v516_v56 = vor.u32 %v515_v52, %v514_v51  ;;  %v462_v60 = vsel %vm450_vm0, %v457_v53, %v461_v50  ;;  %v465_v62 = vor.u32 %v463_v42, %v461_v50  ;;  %v519_v6 = vrot.slane %v467_v63, 2  ;;  %v3312_v50 = vld [vmem:[#allocation7 + $0x10] sm:$0xff]   ;;  %v3314_v51 = vld [vmem:[#allocation7 + $0x58] sm:$0xff]   ;;  %v3322_v59 = vld [vmem:[#allocation7 + $0xa8] sm:$0xff]  }
  0xb3   : > { %2909 = vmatpush3.bf16.msra.mxu1 %v3284_v19  ;;  %908 = vmatprep.mubr.bf16.mxu0 %v462_v60  ;;  %v535_v7 = vrot.slane %v3886_v36, 2  ;;  %v498_v8 = vrot.slane %v3901_v55, 1  ;;  %v475_v9 = vshll.u32 %v3913_v2, 16  ;;  %v479_v10 = vshrl.u32 %v3913_v2, 16  ;;  %v3315_v52 = vld [vmem:[#allocation7 + $0x18] sm:$0xff]   ;;  %v3323_v60 = vld [vmem:[#allocation7 + $0x70] sm:$0xff]  }
  0xb4   : > { %2910 = vmatprep.subr.bf16.mxu1 %v3287_v22  ;;  %v517_v1 = vsel %vm510_vm1, %v3899_v54, %v516_v56  ;;  %v537_v11 = vrot.slane %v3901_v55, 2  ;;  %v470_v12 = vsel %vm450_vm0, %v465_v62, %v469_v4  ;;  %v520_v14 = vor.u32 %v519_v6, %v518_v5  ;;  %v3300_v22 = vld [vmem:[#allocation5 + $0x118] sm:$0xff]   ;;  %v3325_v62 = vld [vmem:[#allocation7 + $0xb0] sm:$0xff]  }
  0xb5   : > { %2871 = vmatpush3.bf16.msra.mxu0 %v3286_v21  ;;  %973 = vmatprep.mubr.bf16.mxu1 %v517_v1  ;;  %v473_v15 = vor.u32 %v471_v0, %v469_v4  ;;  %v500_v16 = vrot.slane %v3913_v2, 1  ;;  %v477_v17 = vrot.slane %v475_v9, 1  ;;  %v522_v18 = vrot.slane %v479_v10, 1  ;;  %v3316_v53 = vld [vmem:[#allocation7 + $0x98] sm:$0xff]   ;;  %v2697_v4 = vld [vmem:[%s4076_s2] ss:$0 sm:$0xff] }
  0xb6   : > { %2872 = vmatprep.subr.bf16.mxu0 %v3289_v24  ;;  %v523_v19 = vrot.slane %v475_v9, 2  ;;  %v539_v20 = vrot.slane %v3913_v2, 2  ;;  %v521_v21 = vsel %vm510_vm1, %v516_v56, %v520_v14  ;;  %v538_v41 = vsel %vm533_vm6, %v535_v7, %v537_v11  ;;  %v3319_v56 = vld [vmem:[#allocation7 + $0xa0] sm:$0xff]   ;;  %v3326_v63 = vld [vmem:[#allocation7 + $0x78] sm:$0xff]  }
  0xb7   : > { %2911 = vmatpush3.bf16.msra.mxu1 %v3288_v23  ;;  %v501_v32 = vsel %vm494_vm2, %v498_v8, %v500_v16  ;;  %v508_v39 = vsel %vm494_vm2, %v500_v16, %v495_v43  ;;  %v3327_v0 = vld [vmem:[#allocation7 + $0x38] sm:$0xff]   ;;  %v1963_v23 = vld [vmem:[#allocation10 + $0x80] sm:$0xff] }
  0xb8   : > { %2912 = vmatprep.subr.bf16.mxu1 %v3291_v26  ;;  %v524_v24 = vor.u32 %v523_v19, %v522_v18  ;;  %v499_v26 = vsel %vm494_vm2, %v496_v44, %v498_v8  ;;  %v540_v42 = vsel %vm533_vm6, %v537_v11, %v539_v20  ;;  %v547_v43 = vsel %vm533_vm6, %v539_v20, %v534_v3  ;;  %v3305_v44 = vld [vmem:[#allocation7 + $0x40] sm:$0xff]   ;;  %v3328_v1 = vld [vmem:[#allocation7 + $0xb8] sm:$0xff]  }
  0xb9   : > { %2873 = vmatpush3.bf16.msra.mxu0 %v3290_v25 }
  0xba   : > { %2874 = vmatprep.subr.bf16.mxu0 %v3293_v28  ;;  %v3301_v28 = vld [vmem:[#allocation5 + $0x120] sm:$0xff]  }
  0xbb   : > { %2913 = vmatpush3.bf16.msra.mxu1 %v3292_v27  ;;  %v478_v27 = vsel %vm450_vm0, %v473_v15, %v477_v17 }
  0xbc   : > { %2914 = vmatprep.subr.bf16.mxu1 %v3295_v30  ;;  %v481_v30 = vor.u32 %v479_v10, %v477_v17 }
  0xbd   : > { %2875 = vmatpush3.bf16.msra.mxu0 %v3294_v29  ;;  %v525_v29 = vsel %vm510_vm1, %v520_v14, %v524_v24 }
  0xbe   : > { %3065 = vmatprep.subr.bf16.mxu0 %v3297_v40  ;;  %v489_v33 = vsel %vm3928_vm4, %v481_v30, %v3894_v45  ;;  %v3306_v45 = vld [vmem:[#allocation7] sm:$0xff]  }
  0xbf   : > { %2915 = vmatpush3.bf16.msra.mxu1 %v3296_v37  ;;  %v532_v37 = vsel %vm3934_vm5, %v524_v24, %v3899_v54  ;;  %v3317_v54 = vld [vmem:[#allocation7 + $0x60] sm:$0xff]  }
  0xc0   : > { %909 = vmatmul.mubr.bf16.vlgmr.msra.gmra.mrb[0].mxu0 %v3884_v35  ;;  %2952 = vmatprep.subr.bf16.mxu1 %v3305_v44  ;;  %v3313_v35 = vld [vmem:[#allocation7 + $0x90] sm:$0xff]  }
  0xc1   : > { %3066 = vmatpush3.bf16.msra.mxu0 %v3297_v40  ;;  %916 = vmatprep.mubr.bf16.mxu0 %v470_v12  ;;  %v536_v40 = vsel %vm533_vm6, %v534_v3, %v535_v7 }
  0xc2   : > { %974 = vmatmul.mubr.bf16.vlgmr.msra.gmra.mrb[0].mxu1 %v497_v57  ;;  %3067 = vmatprep.subr.bf16.mxu0 %v3298_v61  ;;  %v3320_v57 = vld [vmem:[#allocation7 + $0x68] sm:$0xff]  }
  0xc3   : > { %981 = vmatprep.mubr.bf16.mxu1 %v521_v21  ;;  %2953 = vmatpush3.bf16.msra.mxu1 %v3306_v45 }
  0xc4   : > { %2954 = vmatprep.subr.bf16.mxu1 %v3308_v47 }
  0xc5   : > { %3068 = vmatpush3.bf16.msra.mxu0 %v3298_v61  ;;  %v3324_v61 = vld [vmem:[#allocation7 + $0x30] sm:$0xff]  }
  0xc6   : > { %3069 = vmatprep.subr.bf16.mxu0 %v3299_v13 }
  0xc7   : > { %2955 = vmatpush3.bf16.msra.mxu1 %v3309_v48 }
  0xc8   : > { %917 = vmatmul.mubr.bf16.gmra.mrb[4].mxu0 %v3886_v36  ;;  %v3310_v36 = vld [vmem:[#allocation7 + $0x88] sm:$0xff]   ;;  %2956 = vmatprep.subr.bf16.mxu1 %v3311_v49 }
  0xc9   : > { %3070 = vmatpush3.bf16.msra.mxu0 %v3299_v13  ;;  %924 = vmatprep.mubr.bf16.mxu0 %v478_v27 }
  0xca   : > { %982 = vmatmul.mubr.bf16.gmra.mrb[4].mxu1 %v499_v26  ;;  %3071 = vmatprep.subr.bf16.mxu0 %v3300_v22 }
  0xcb   : > { %989 = vmatprep.mubr.bf16.mxu1 %v525_v29  ;;  %2957 = vmatpush3.bf16.msra.mxu1 %v3312_v50 }
  0xcc   : > { %2958 = vmatprep.subr.bf16.mxu1 %v3314_v51 }
  0xcd   : > { %3072 = vmatpush3.bf16.msra.mxu0 %v3300_v22 }
  0xce   : > { %3073 = vmatprep.subr.bf16.mxu0 %v3301_v28 }
  0xcf   : > { %2959 = vmatpush3.bf16.msra.mxu1 %v3315_v52 }
  0xd0   : > { %925 = vmatmul.mubr.bf16.gmra.mrb[8].mxu0 %v3901_v55  ;;  %v3318_v55 = vld [vmem:[#allocation7 + $0x20] sm:$0xff]   ;;  %2960 = vmatprep.subr.bf16.mxu1 %v3317_v54 }
  0xd1   : > { %3074 = vmatpush3.bf16.msra.mxu0 %v3301_v28  ;;  %932 = vmatprep.mubr.bf16.mxu0 %v489_v33 }
  0xd2   : > { %990 = vmatmul.mubr.bf16.gmra.mrb[8].mxu1 %v501_v32  ;;  %3075 = vmatprep.subr.bf16.mxu0 %v3302_v31 }
  0xd3   : > { %997 = vmatprep.mubr.bf16.mxu1 %v532_v37  ;;  %2961 = vmatpush3.bf16.msra.mxu1 %v3318_v55 }
  0xd4   : > { %2962 = vmatprep.subr.bf16.mxu1 %v3320_v57 }
  0xd5   : > { %3076 = vmatpush3.bf16.msra.mxu0 %v3302_v31 }
  0xd6   : > { %3077 = vmatprep.subr.bf16.mxu0 %v3303_v34 }
  0xd7   : > { %2963 = vmatpush3.bf16.msra.mxu1 %v3321_v58 }
  0xd8   : > { %933 = vmatmul.mubr.bf16.gmra.mrb[12].mxu0 %v3913_v2  ;;  %2964 = vmatprep.subr.bf16.mxu1 %v3323_v60  ;;  %v3329_v2 = vld [vmem:[#allocation8 + $0x40] sm:$0xff]  }
  0xd9   : > { %3078 = vmatpush3.bf16.msra.mxu0 %v3303_v34  ;;  %3081 = vmatprep.mubr.bf16.mxu0 %v536_v40 }
  0xda   : > { %998 = vmatmul.mubr.bf16.gmra.mrb[12].mxu1 %v508_v39  ;;  %3079 = vmatprep.subr.bf16.mxu0 %v3304_v38 }
  0xdb   : > { %2965 = vmatpush3.bf16.msra.mxu1 %v3324_v61 }
  0xdc   : > { %2966 = vmatprep.subr.bf16.mxu1 %v3326_v63 }
  0xdd   : > { %3080 = vmatpush3.bf16.msra.mxu0 %v3304_v38 }
  0xde   : > { %3089 = vmatprep.subr.bf16.mxu0 %v3307_v46 }
  0xdf   : > { %2967 = vmatpush3.bf16.msra.mxu1 %v3327_v0 }
  0xe0   : > { %3082 = vmatmul.mubr.bf16.vlgmr.msra.gmra.mrb[16].mxu0 %v538_v41  ;;  %3004 = vmatprep.subr.bf16.mxu1 %v3329_v2 }
  0xe1   : > { %3085 = vmatprep.mubr.bf16.mxu0 %v540_v42  ;;  %3090 = vmatpush3.bf16.msra.mxu0 %v3307_v46 }
  0xe2   : > { %3091 = vmatprep.subr.bf16.mxu0 %v3310_v36 }
  0xe5   : > { %3092 = vmatpush3.bf16.msra.mxu0 %v3310_v36 }
  0xe6   : > { %3093 = vmatprep.subr.bf16.mxu0 %v3313_v35 }
  0xe8   : > { %3086 = vmatmul.mubr.bf16.gmra.mrb[20].mxu0 %v547_v43 }
  0xe9   : > { %3094 = vmatpush3.bf16.msra.mxu0 %v3313_v35 }
  0xea   : > { %3095 = vmatprep.subr.bf16.mxu0 %v3316_v53 }
  0xed   : > { %3096 = vmatpush3.bf16.msra.mxu0 %v3316_v53 }
  0xee   : > { %3097 = vmatprep.subr.bf16.mxu0 %v3319_v56 }
  0xf1   : > { %3098 = vmatpush3.bf16.msra.mxu0 %v3319_v56 }
  0xf2   : > { %3099 = vmatprep.subr.bf16.mxu0 %v3322_v59 }
  0xf5   : > { %3100 = vmatpush3.bf16.msra.mxu0 %v3322_v59 }
  0xf6   : > { %3101 = vmatprep.subr.bf16.mxu0 %v3325_v62 }
  0xf9   : > { %3102 = vmatpush3.bf16.msra.mxu0 %v3325_v62 }
  0xfa   : > { %3103 = vmatprep.subr.bf16.mxu0 %v3328_v1 }
  0xfd   : > { %3104 = vmatpush3.bf16.msra.mxu0 %v3328_v1 }
 0x193   : > { %v2876_v3 = vpop.f32.mrb[0].mxu0 }
 0x194   : > { %v2877_v5 = vpop.f32.mrb[1].mxu0 }
 0x195   : > { %v2916_v6 = vpop.f32.mrb[0].mxu1  ;;  %v2878_v7 = vadd.f32 %v2877_v5, %v2876_v3  ;;  %v2879_v8 = vpop.f32.mrb[2].mxu0 }
 0x196   : > { %v2917_v9 = vpop.f32.mrb[1].mxu1  ;;  %v2880_v10 = vpop.f32.mrb[3].mxu0 }
 0x197   : > { %v2918_v11 = vadd.f32 %v2917_v9, %v2916_v6  ;;  %v2919_v12 = vpop.f32.mrb[2].mxu1  ;;  %v911_v13 = vadd.f32 %v2878_v7, %v2697_v4  ;;  %v2881_v14 = vadd.f32 %v2880_v10, %v2879_v8 }
 0x198   : > { %v2920_v15 = vpop.f32.mrb[3].mxu1 }
 0x199   : > { %v2921_v16 = vadd.f32 %v2920_v15, %v2919_v12  ;;  %v914_v17 = vadd.f32 %v2881_v14, %v2697_v4  ;;  %v976_v18 = vadd.f32 %v2918_v11, %v911_v13 }
 0x19b   : > { %v2882_v19 = vpop.f32.mrb[4].mxu0  ;;  %v979_v20 = vadd.f32 %v2921_v16, %v914_v17 }
 0x19c   : > { %v2883_v21 = vpop.f32.mrb[5].mxu0 }
 0x19d   : > { %v2922_v22 = vpop.f32.mrb[4].mxu1  ;;  %v2884_v24 = vadd.f32 %v2883_v21, %v2882_v19  ;;  %v2885_v25 = vpop.f32.mrb[6].mxu0 }
 0x19e   : > { %v2923_v26 = vpop.f32.mrb[5].mxu1  ;;  %v2886_v27 = vpop.f32.mrb[7].mxu0 }
 0x19f   : > { %v2924_v28 = vadd.f32 %v2923_v26, %v2922_v22  ;;  %v2925_v29 = vpop.f32.mrb[6].mxu1  ;;  %v919_v30 = vadd.f32 %v2884_v24, %v2697_v4  ;;  %v2887_v31 = vadd.f32 %v2886_v27, %v2885_v25 }
 0x1a0   : > { %v2926_v32 = vpop.f32.mrb[7].mxu1 }
 0x1a1   : > { %v2927_v33 = vadd.f32 %v2926_v32, %v2925_v29  ;;  %v922_v34 = vadd.f32 %v2887_v31, %v2697_v4  ;;  %v984_v37 = vadd.f32 %v2924_v28, %v919_v30 }
 0x1a3   : > { %v2888_v38 = vpop.f32.mrb[8].mxu0  ;;  %v987_v39 = vadd.f32 %v2927_v33, %v922_v34 }
 0x1a4   : > { %v2889_v40 = vpop.f32.mrb[9].mxu0 }
 0x1a5   : > { %v2928_v41 = vpop.f32.mrb[8].mxu1  ;;  %v2890_v42 = vadd.f32 %v2889_v40, %v2888_v38  ;;  %v2891_v43 = vpop.f32.mrb[10].mxu0 }
 0x1a6   : > { %v2929_v44 = vpop.f32.mrb[9].mxu1  ;;  %v2892_v45 = vpop.f32.mrb[11].mxu0 }
 0x1a7   : > { %v2930_v46 = vadd.f32 %v2929_v44, %v2928_v41  ;;  %v2931_v47 = vpop.f32.mrb[10].mxu1  ;;  %v927_v48 = vadd.f32 %v2890_v42, %v2697_v4  ;;  %v2893_v36 = vadd.f32 %v2892_v45, %v2891_v43  ;;  %v3330_v44 = vld [vmem:[#allocation8] sm:$0xff]  }
 0x1a8   : > { %v2932_v49 = vpop.f32.mrb[11].mxu1 }
 0x1a9   : > { %v2933_v50 = vadd.f32 %v2932_v49, %v2931_v47  ;;  %v930_v35 = vadd.f32 %v2893_v36, %v2697_v4  ;;  %v992_v51 = vadd.f32 %v2930_v46, %v927_v48 }
 0x1ab   : > { %v2894_v52 = vpop.f32.mrb[12].mxu0  ;;  %v995_v53 = vadd.f32 %v2933_v50, %v930_v35 }
 0x1ac   : > { %v2895_v54 = vpop.f32.mrb[13].mxu0 }
 0x1ad   : > { %v2934_v55 = vpop.f32.mrb[12].mxu1  ;;  %v2896_v56 = vadd.f32 %v2895_v54, %v2894_v52  ;;  %v2897_v57 = vpop.f32.mrb[14].mxu0 }
 0x1ae   : > { %v2935_v58 = vpop.f32.mrb[13].mxu1  ;;  %v2898_v59 = vpop.f32.mrb[15].mxu0 }
 0x1af   : > { %v2936_v60 = vadd.f32 %v2935_v58, %v2934_v55  ;;  %v2937_v61 = vpop.f32.mrb[14].mxu1  ;;  %v935_v62 = vadd.f32 %v2896_v56, %v2697_v4  ;;  %v2899_v63 = vadd.f32 %v2898_v59, %v2897_v57 }
 0x1b0   : > { %v2938_v0 = vpop.f32.mrb[15].mxu1 }
 0x1b1   : > { %v2939_v1 = vadd.f32 %v2938_v0, %v2937_v61  ;;  %v938_v2 = vadd.f32 %v2899_v63, %v2697_v4  ;;  %v1000_v3 = vadd.f32 %v2936_v60, %v935_v62  ;;  %v3331_v63 = vld [vmem:[#allocation8 + $0x48] sm:$0xff]  }
 0x1b2   : > { %v3332_v0 = vld [vmem:[#allocation8 + $0x8] sm:$0xff]  }
 0x1b3   : > { %v3083_v5 = vpop.f32.mrb[16].mxu0  ;;  %v1003_v6 = vadd.f32 %v2939_v1, %v938_v2  ;;  %v3333_v1 = vld [vmem:[#allocation8 + $0x80] sm:$0xff]   ;;  %v3334_v2 = vld [vmem:[#allocation8 + $0x50] sm:$0xff]  }
 0x1b4   : > { %v1049_v7 = vadd.f32 %v3083_v5, %v984_v37  ;;  %v1040_v8 = vpop.f32.mrb[17].mxu0  ;;  %3113 = vmatprep.subr.bf16.mxu0 %v3333_v1  ;;  %v3336_v5 = vld [vmem:[#allocation8 + $0x88] sm:$0xff]  }
 0x1b5   : > { %v1041_v9 = vadd.f32 %v1040_v8, %v976_v18  ;;  %v3084_v10 = vpop.f32.mrb[18].mxu0  ;;  %v3339_v8 = vld [vmem:[#allocation8 + $0x90] sm:$0xff]  }
 0x1b6   : > { %v1052_v11 = vadd.f32 %v3084_v10, %v987_v39  ;;  %v1043_v12 = vpop.f32.mrb[19].mxu0  ;;  %v1073_v14 = vmax.f32 %v1049_v7, 0.0  ;;  %v3338_v7 = vld [vmem:[#allocation8 + $0x18] sm:$0xff]   ;;  %v3341_v10 = vld [vmem:[#allocation8 + $0x20] sm:$0xff]  }
 0x1b7   : > { %v1044_v13 = vadd.f32 %v1043_v12, %v979_v20  ;;  %v1071_v16 = vmax.f32 %v1041_v9, 0.0  ;;  %v3340_v9 = vld [vmem:[#allocation8 + $0x60] sm:$0xff]   ;;  %v3343_v12 = vld [vmem:[#allocation8 + $0x68] sm:$0xff]  }
 0x1b8   : > { %v1074_v15 = vmax.f32 %v1052_v11, 0.0  ;;  %v3342_v11 = vld [vmem:[#allocation8 + $0x98] sm:$0xff]  }
 0x1b9   : > { %v1072_v17 = vmax.f32 %v1044_v13, 0.0  ;;  %v3344_v13 = vld [vmem:[#allocation8 + $0x28] sm:$0xff]  }
 0x1ba   : > { %v1080_v19 = vpack.c.bf16 %v1074_v15, %v1073_v14  ;;  %v3345_v14 = vld [vmem:[#allocation8 + $0xa0] sm:$0xff]   ;;  %v3346_v15 = vld [vmem:[#allocation8 + $0x70] sm:$0xff]  }
 0x1bb   : > { %v1079_v21 = vpack.c.bf16 %v1072_v17, %v1071_v16  ;;  %v3087_v22 = vpop.f32.mrb[20].mxu0  ;;  %v3347_v16 = vld [vmem:[#allocation8 + $0x30] sm:$0xff]   ;;  %v3348_v17 = vld [vmem:[#allocation8 + $0xa8] sm:$0xff]  }
 0x1bc   : > { %v1065_v24 = vadd.f32 %v3087_v22, %v1000_v3  ;;  %v1056_v25 = vpop.f32.mrb[21].mxu0  ;;  %v1125_v4 = vrot.slane %v1080_v19, 1  ;;  %v1091_v30 = vshll.u32 %v1080_v19, 16  ;;  %v1095_v48 = vshrl.u32 %v1080_v19, 16  ;;  %v3335_v3 = vld [vmem:[#allocation8 + $0x10] sm:$0xff]  }
 0x1bd   : > { %v1057_v26 = vadd.f32 %v1056_v25, %v992_v51  ;;  %v3088_v27 = vpop.f32.mrb[22].mxu0  ;;  %v1124_v28 = vrot.slane %v1079_v21, 1  ;;  %v1086_v29 = vshll.u32 %v1079_v21, 16  ;;  %v1084_v33 = vshrl.u32 %v1079_v21, 16  ;;  %v3351_v22 = vld [vmem:[#allocation8 + $0xb0] sm:$0xff]  }
 0x1be   : > { %v1068_v18 = vadd.f32 %v3088_v27, %v1003_v6  ;;  %v1059_v31 = vpop.f32.mrb[23].mxu0  ;;  %v1077_v37 = vmax.f32 %v1065_v24, 0.0  ;;  %v1093_v42 = vrot.slane %v1091_v30, 1  ;;  %v3337_v6 = vld [vmem:[#allocation8 + $0x58] sm:$0xff]  }
 0x1bf   : > { %v1060_v32 = vadd.f32 %v1059_v31, %v995_v53  ;;  %v1126_v20 = vsel %vm494_vm2, %v1124_v28, %v1125_v4  ;;  %v1088_v34 = vrot.slane %v1086_v29, 1  ;;  %v1075_v39 = vmax.f32 %v1057_v26, 0.0  ;;  %v3352_v24 = vld [vmem:[#allocation8 + $0xb8] sm:$0xff]   ;;  %v3981_v26 = vld [vmem:[%s4078_s4] ss:$0 sm:$0xff] }
 0x1c0   : > { %v1078_v38 = vmax.f32 %v1068_v18, 0.0  ;;  %3105 = vmatprep.mubr.bf16.mxu0 %v1126_v20  ;;  %v1097_v35 = vor.u32 %v1095_v48, %v1093_v42 }
 0x1c1   : > { %v1076_v40 = vmax.f32 %v1060_v32, 0.0  ;;  %v1089_v41 = vor.u32 %v1088_v34, %v1084_v33 }
 0x1c2   : > { %v1082_v43 = vpack.c.bf16 %v1078_v38, %v1077_v37 }
 0x1c3   : > { %v1081_v45 = vpack.c.bf16 %v1076_v40, %v1075_v39  ;;  %v1094_v46 = vsel %vm450_vm0, %v1089_v41, %v1093_v42 }
 0x1c4   : > { %1369 = vmatprep.mubr.bf16.mxu1 %v1094_v46  ;;  %v1129_v47 = vrot.slane %v1082_v43, 1  ;;  %v1107_v36 = vshll.u32 %v1082_v43, 16  ;;  %v1111_v53 = vshrl.u32 %v1082_v43, 16 }
 0x1c5   : > { %1370 = vmatmul.mubr.bf16.vlgmr.msra.gmra.mrb[16].mxu1 %v1079_v21  ;;  %v1127_v49 = vrot.slane %v1081_v45, 1  ;;  %v1099_v50 = vshll.u32 %v1081_v45, 16  ;;  %v1103_v57 = vshrl.u32 %v1081_v45, 16  ;;  %v3350_v21 = vld [vmem:[#allocation8 + $0x38] sm:$0xff]  }
 0x1c6   : > { %v1109_v51 = vrot.slane %v1107_v36, 1  ;;  %v1136_v52 = vsel %vm494_vm2, %v1129_v47, %v1124_v28  ;;  %3005 = vmatpush3.bf16.msra.mxu1 %v3330_v44 }
 0x1c7   : > { %v1128_v54 = vsel %vm494_vm2, %v1125_v4, %v1127_v49  ;;  %v1130_v55 = vsel %vm494_vm2, %v1127_v49, %v1129_v47  ;;  %v1101_v56 = vrot.slane %v1099_v50, 1  ;;  %3006 = vmatprep.subr.bf16.mxu1 %v3331_v63 }
 0x1c8   : > { %3106 = vmatmul.mubr.bf16.vlgmr.msra.gmra.mrb[24].mxu0 %v1128_v54  ;;  %v1113_v58 = vor.u32 %v1111_v53, %v1109_v51 }
 0x1c9   : > { %3109 = vmatprep.mubr.bf16.mxu0 %v1130_v55  ;;  %v1102_v59 = vsel %vm450_vm0, %v1097_v35, %v1101_v56  ;;  %v1105_v60 = vor.u32 %v1103_v57, %v1101_v56  ;;  %3114 = vmatpush3.bf16.msra.mxu0 %v3333_v1 }
 0x1ca   : > { %1377 = vmatprep.mubr.bf16.mxu1 %v1102_v59  ;;  %v1119_v61 = vsel %vm3928_vm4, %v1113_v58, %v1088_v34  ;;  %3007 = vmatpush3.bf16.msra.mxu1 %v3332_v0 }
 0x1cb   : > { %v1110_v62 = vsel %vm450_vm0, %v1105_v60, %v1109_v51  ;;  %3008 = vmatprep.subr.bf16.mxu1 %v3334_v2  ;;  %3115 = vmatprep.subr.bf16.mxu0 %v3336_v5 }
 0x1cd   : > { %1378 = vmatmul.mubr.bf16.gmra.mrb[20].mxu1 %v1080_v19  ;;  %3116 = vmatpush3.bf16.msra.mxu0 %v3336_v5  ;;  %v3349_v19 = vld [vmem:[#allocation8 + $0x78] sm:$0xff]  }
 0x1ce   : > { %1385 = vmatprep.mubr.bf16.mxu1 %v1110_v62  ;;  %3009 = vmatpush3.bf16.msra.mxu1 %v3335_v3 }
 0x1cf   : > { %3010 = vmatprep.subr.bf16.mxu1 %v3337_v6  ;;  %3117 = vmatprep.subr.bf16.mxu0 %v3339_v8 }
 0x1d0   : > { %3110 = vmatmul.mubr.bf16.gmra.mrb[28].mxu0 %v1136_v52 }
 0x1d1   : > { %3118 = vmatpush3.bf16.msra.mxu0 %v3339_v8 }
 0x1d2   : > { %3011 = vmatpush3.bf16.msra.mxu1 %v3338_v7  ;;  %3119 = vmatprep.subr.bf16.mxu0 %v3342_v11 }
 0x1d3   : > { %3012 = vmatprep.subr.bf16.mxu1 %v3340_v9 }
 0x1d5   : > { %1386 = vmatmul.mubr.bf16.gmra.mrb[24].mxu1 %v1081_v45  ;;  %3120 = vmatpush3.bf16.msra.mxu0 %v3342_v11 }
 0x1d6   : > { %1393 = vmatprep.mubr.bf16.mxu1 %v1119_v61  ;;  %3013 = vmatpush3.bf16.msra.mxu1 %v3341_v10 }
 0x1d7   : > { %3014 = vmatprep.subr.bf16.mxu1 %v3343_v12  ;;  %3121 = vmatprep.subr.bf16.mxu0 %v3345_v14 }
 0x1d9   : > { %3122 = vmatpush3.bf16.msra.mxu0 %v3345_v14 }
 0x1da   : > { %3015 = vmatpush3.bf16.msra.mxu1 %v3344_v13  ;;  %3123 = vmatprep.subr.bf16.mxu0 %v3348_v17 }
 0x1db   : > { %3016 = vmatprep.subr.bf16.mxu1 %v3346_v15 }
 0x1dd   : > { %1394 = vmatmul.mubr.bf16.gmra.mrb[28].mxu1 %v1082_v43  ;;  %3124 = vmatpush3.bf16.msra.mxu0 %v3348_v17 }
 0x1de   : > { %3017 = vmatpush3.bf16.msra.mxu1 %v3347_v16  ;;  %3125 = vmatprep.subr.bf16.mxu0 %v3351_v22 }
 0x1df   : > { %3018 = vmatprep.subr.bf16.mxu1 %v3349_v19 }
 0x1e1   : > { %3126 = vmatpush3.bf16.msra.mxu0 %v3351_v22 }
 0x1e2   : > { %3019 = vmatpush3.bf16.msra.mxu1 %v3350_v21  ;;  %3127 = vmatprep.subr.bf16.mxu0 %v3352_v24 }
 0x1e5   : > { %3128 = vmatpush3.bf16.msra.mxu0 %v3352_v24 }
 0x298   : > { %v2968_v25 = vpop.f32.mrb[16].mxu1 }
 0x299   : > { %v2969_v4 = vpop.f32.mrb[17].mxu1 }
 0x29a   : > { %v2970_v27 = vadd.f32 %v2969_v4, %v2968_v25  ;;  %v2971_v28 = vpop.f32.mrb[18].mxu1 }
 0x29b   : > { %v2972_v29 = vpop.f32.mrb[19].mxu1  ;;  %v3107_v30 = vpop.f32.mrb[24].mxu0 }
 0x29c   : > { %v2973_v18 = vadd.f32 %v2972_v29, %v2971_v28  ;;  %v1372_v31 = vadd.f32 %v2970_v27, %v3981_v26  ;;  %v1436_v32 = vpop.f32.mrb[25].mxu0 }
 0x29d   : > { %v3108_v20 = vpop.f32.mrb[26].mxu0 }
 0x29e   : > { %v1437_v33 = vadd.f32 %v1436_v32, %v1372_v31  ;;  %v1375_v34 = vadd.f32 %v2973_v18, %v3981_v26  ;;  %v1439_v37 = vpop.f32.mrb[27].mxu0 }
 0x2a0   : > { %v1440_v38 = vadd.f32 %v1439_v37, %v1375_v34  ;;  %v2974_v39 = vpop.f32.mrb[20].mxu1  ;;  %v1467_v41 = vmax.f32 %v1437_v33, 0.0 }
 0x2a1   : > { %v2975_v40 = vpop.f32.mrb[21].mxu1 }
 0x2a2   : > { %v1468_v42 = vmax.f32 %v1440_v38, 0.0  ;;  %v2976_v43 = vadd.f32 %v2975_v40, %v2974_v39  ;;  %v2977_v44 = vpop.f32.mrb[22].mxu1 }
 0x2a3   : > { %v2978_v45 = vpop.f32.mrb[23].mxu1  ;;  %v3111_v46 = vpop.f32.mrb[28].mxu0 }
 0x2a4   : > { %v3985_v47 = vpack.c.bf16 %v1468_v42, %v1467_v41  ;;  %v1380_v48 = vadd.f32 %v2976_v43, %v3981_v26  ;;  %v2979_v36 = vadd.f32 %v2978_v45, %v2977_v44  ;;  %v1452_v49 = vpop.f32.mrb[29].mxu0 }
 0x2a5   : > { %v3112_v50 = vpop.f32.mrb[30].mxu0 }
 0x2a6   : > { %v1445_v35 = vadd.f32 %v3107_v30, %v1380_v48  ;;  %v1383_v51 = vadd.f32 %v2979_v36, %v3981_v26  ;;  %v1455_v52 = vpop.f32.mrb[31].mxu0  ;;  %v1482_v55 = vshll.u32 %v3985_v47, 16  ;;  %v1520_v2 = vrot.slane %v3985_v47, 1 }
 0x2a7   : > { %v1480_v3 = vshrl.u32 %v3985_v47, 16 }
 0x2a8   : > { %v1448_v53 = vadd.f32 %v3108_v20, %v1383_v51  ;;  %v2980_v54 = vpop.f32.mrb[24].mxu1  ;;  %v1469_v57 = vmax.f32 %v1445_v35, 0.0  ;;  %v1484_v1 = vrot.slane %v1482_v55, 1  ;;  %v1947_v35 = vld [vmem:[#allocation10] sm:$0xff] }
 0x2a9   : > { %v2981_v56 = vpop.f32.mrb[25].mxu1  ;;  %v1951_v51 = vld [vmem:[#allocation10 + $0x20] sm:$0xff] }
 0x2aa   : > { %v1470_v58 = vmax.f32 %v1448_v53, 0.0  ;;  %v2982_v59 = vadd.f32 %v2981_v56, %v2980_v54  ;;  %v2983_v60 = vpop.f32.mrb[26].mxu1  ;;  %v1485_v12 = vor.u32 %v1484_v1, %v1480_v3  ;;  %v2790_v53 = vcombine.high %v1947_v35, %v1951_v51  ;;  %v1955_v54 = vld [vmem:[#allocation10 + $0x40] sm:$0xff] }
 0x2ab   : > { %v2984_v61 = vpop.f32.mrb[27].mxu1  ;;  %v1959_v55 = vld [vmem:[#allocation10 + $0x60] sm:$0xff] }
 0x2ac   : > { %v1476_v62 = vpack.c.bf16 %v1470_v58, %v1469_v57  ;;  %v1388_v63 = vadd.f32 %v2982_v59, %v3981_v26  ;;  %v2985_v0 = vadd.f32 %v2984_v61, %v2983_v60  ;;  %v2798_v56 = vcombine.high %v1955_v54, %v1959_v55  ;;  %2373 = vmatprep.subr.bf16.mxu0 %v2790_v53  ;;  %v1967_v58 = vld [vmem:[#allocation10 + $0xa0] sm:$0xff] }
 0x2ad   : > { %v2797_v57 = vcombine.low %v1955_v54, %v1959_v55  ;;  %v2806_v59 = vcombine.high %v1963_v23, %v1967_v58  ;;  %v2805_v60 = vcombine.low %v1963_v23, %v1967_v58  ;;  %v1971_v61 = vld [vmem:[#allocation10 + $0xc0] sm:$0xff] }
 0x2ae   : > { %v1453_v5 = vadd.f32 %v1452_v49, %v1388_v63  ;;  %v1391_v6 = vadd.f32 %v2985_v0, %v3981_v26  ;;  %v1521_v7 = vrot.slane %v1476_v62, 1  ;;  %v1487_v8 = vshll.u32 %v1476_v62, 16 }
 0x2af   : > { %v1491_v27 = vshrl.u32 %v1476_v62, 16  ;;  %v3582_v49 = vmov 0.0|0.0  }
 0x2b0   : > { %v1456_v9 = vadd.f32 %v1455_v52, %v1391_v6  ;;  %v2986_v10 = vpop.f32.mrb[28].mxu1  ;;  %v1522_v11 = vsel %vm494_vm2, %v1520_v2, %v1521_v7  ;;  %v1489_v13 = vrot.slane %v1487_v8, 1  ;;  %v1471_v15 = vmax.f32 %v1453_v5, 0.0  ;;  %3156 = vmatprep.subr.bf16.mxu1 %v3582_v49  ;;  %v1987_v6 = vld [vmem:[#allocation10 + $0x140] sm:$0xff] }
 0x2b1   : > { %v2987_v14 = vpop.f32.mrb[29].mxu1  ;;  %3129 = vmatprep.mubr.bf16.mxu0 %v1522_v11  ;;  %v2789_v52 = vcombine.low %v1947_v35, %v1951_v51  ;;  %v1999_v11 = vld [vmem:[#allocation10 + $0x1a0] sm:$0xff] }
 0x2b2   : > { %v1472_v16 = vmax.f32 %v1456_v9, 0.0  ;;  %v2988_v17 = vadd.f32 %v2987_v14, %v2986_v10  ;;  %v2989_v19 = vpop.f32.mrb[30].mxu1  ;;  %v1490_v21 = vsel %vm450_vm0, %v1485_v12, %v1489_v13  ;;  %v1493_v20 = vor.u32 %v1491_v27, %v1489_v13  ;;  %v1995_v10 = vld [vmem:[#allocation10 + $0x180] sm:$0xff] }
 0x2b3   : > { %v2990_v22 = vpop.f32.mrb[31].mxu1  ;;  %1765 = vmatprep.mubr.bf16.mxu1 %v1490_v21  ;;  %v2838_v12 = vcombine.high %v1995_v10, %v1999_v11  ;;  %v2837_v13 = vcombine.low %v1995_v10, %v1999_v11  ;;  %v2003_v14 = vld [vmem:[#allocation10 + $0x1c0] sm:$0xff] }
 0x2b4   : > { %v1477_v24 = vpack.c.bf16 %v1472_v16, %v1471_v15  ;;  %v1396_v25 = vadd.f32 %v2988_v17, %v3981_v26  ;;  %v2991_v4 = vadd.f32 %v2990_v22, %v2989_v19  ;;  %1766 = vmatmul.mubr.bf16.vlgmr.msra.gmra.mrb[32].mxu1 %v3985_v47  ;;  %v2007_v15 = vld [vmem:[#allocation10 + $0x1e0] sm:$0xff] }
 0x2b5   : > { %v2846_v16 = vcombine.high %v2003_v14, %v2007_v15  ;;  %v2845_v17 = vcombine.low %v2003_v14, %v2007_v15  ;;  %v2763_v22 = vld [vmem:[%s4080_s6] ss:$0 sm:$0xff]  ;;  %v1952_v14 = vld [vmem:[#allocation10 + $0x28] sm:$0xff] }
 0x2b6   : > { %v1461_v28 = vadd.f32 %v3111_v46, %v1396_v25  ;;  %v1399_v29 = vadd.f32 %v2991_v4, %v3981_v26  ;;  %v1523_v30 = vrot.slane %v1477_v24, 1  ;;  %v1495_v18 = vshll.u32 %v1477_v24, 16 }
 0x2b7   : > { %v1499_v40 = vshrl.u32 %v1477_v24, 16 }
 0x2b8   : > { %v1464_v31 = vadd.f32 %v3112_v50, %v1399_v29  ;;  %v1524_v32 = vsel %vm494_vm2, %v1521_v7, %v1523_v30  ;;  %v1497_v33 = vrot.slane %v1495_v18, 1  ;;  %v1473_v34 = vmax.f32 %v1461_v28, 0.0  ;;  %v1991_v7 = vld [vmem:[#allocation10 + $0x160] sm:$0xff] }
 0x2b9   : > { %3130 = vmatmul.mubr.bf16.vlgmr.msra.gmra.mrb[32].mxu0 %v1524_v32  ;;  %v3584_v50 = vmov 0.0   ;;  %v2830_v8 = vcombine.high %v1987_v6, %v1991_v7  ;;  %v2829_v9 = vcombine.low %v1987_v6, %v1991_v7 }
 0x2ba   : > { %v1474_v37 = vmax.f32 %v1464_v31, 0.0  ;;  %v1498_v38 = vsel %vm450_vm0, %v1493_v20, %v1497_v33  ;;  %v1501_v43 = vor.u32 %v1499_v40, %v1497_v33  ;;  %2374 = vmatpush1.bf16.msra.mxu0 %v2789_v52 }
 0x2bb   : > { %1773 = vmatprep.mubr.bf16.mxu1 %v1498_v38  ;;  %2375 = vmatprep.subr.bf16.mxu0 %v2798_v56 }
 0x2bc   : > { %v1478_v39 = vpack.c.bf16 %v1474_v37, %v1473_v34  ;;  %1774 = vmatmul.mubr.bf16.gmra.mrb[36].mxu1 %v1476_v62  ;;  %v1975_v62 = vld [vmem:[#allocation10 + $0xe0] sm:$0xff] }
 0x2bd   : > { %v2814_v63 = vcombine.high %v1971_v61, %v1975_v62  ;;  %v2813_v0 = vcombine.low %v1971_v61, %v1975_v62 }
 0x2be   : > { %v1525_v41 = vrot.slane %v1478_v39, 1  ;;  %v1503_v42 = vshll.u32 %v1478_v39, 16  ;;  %v1507_v46 = vshrl.u32 %v1478_v39, 16  ;;  %2376 = vmatpush1.bf16.msra.mxu0 %v2797_v57 }
 0x2bf   : > { %2377 = vmatprep.subr.bf16.mxu0 %v2806_v59 }
 0x2c0   : > { %v1526_v26 = vsel %vm494_vm2, %v1523_v30, %v1525_v41  ;;  %v1532_v44 = vsel %vm494_vm2, %v1525_v41, %v1520_v2  ;;  %v1505_v45 = vrot.slane %v1503_v42, 1  ;;  %v1983_v2 = vld [vmem:[#allocation10 + $0x120] sm:$0xff] }
 0x2c1   : > { %3133 = vmatprep.mubr.bf16.mxu0 %v1526_v26 }
 0x2c2   : > { %3134 = vmatmul.mubr.bf16.gmra.mrb[36].mxu0 %v1532_v44  ;;  %v1506_v47 = vsel %vm450_vm0, %v1501_v43, %v1505_v45  ;;  %v1509_v48 = vor.u32 %v1507_v46, %v1505_v45 }
 0x2c3   : > { %1781 = vmatprep.mubr.bf16.mxu1 %v1506_v47  ;;  %2378 = vmatpush1.bf16.msra.mxu0 %v2805_v60 }
 0x2c4   : > { %1782 = vmatmul.mubr.bf16.gmra.mrb[40].mxu1 %v1477_v24  ;;  %v1515_v36 = vsel %vm3928_vm4, %v1509_v48, %v1484_v1  ;;  %2379 = vmatprep.subr.bf16.mxu0 %v2814_v63  ;;  %v1979_v1 = vld [vmem:[#allocation10 + $0x100] sm:$0xff] }
 0x2c5   : > { %1789 = vmatprep.mubr.bf16.mxu1 %v1515_v36  ;;  %v2822_v3 = vcombine.high %v1979_v1, %v1983_v2  ;;  %v2821_v5 = vcombine.low %v1979_v1, %v1983_v2 }
 0x2c7   : > { %2380 = vmatpush1.bf16.msra.mxu0 %v2813_v0 }
 0x2c8   : > { %2381 = vmatprep.subr.bf16.mxu0 %v2822_v3 }
 0x2cb   : > { %2382 = vmatpush1.bf16.msra.mxu0 %v2821_v5 }
 0x2cc   : > { %1790 = vmatmul.mubr.bf16.gmra.mrb[44].mxu1 %v1478_v39  ;;  %2383 = vmatprep.subr.bf16.mxu0 %v2830_v8 }
 0x2cd   : > { %3153 = vmatprep.mubr.msk.f32.mxu1 %vm3583_vm7, %v3584_v50 }
 0x2cf   : > { %2384 = vmatpush1.bf16.msra.mxu0 %v2829_v9 }
 0x2d0   : > { %2385 = vmatprep.subr.bf16.mxu0 %v2838_v12 }
 0x2d3   : > { %2386 = vmatpush1.bf16.msra.mxu0 %v2837_v13  ;;  %v1948_v13 = vld [vmem:[#allocation10 + $0x8] sm:$0xff] }
 0x2d4   : > { %2387 = vmatprep.subr.bf16.mxu0 %v2846_v16 }
 0x2d7   : > { %2388 = vmatpush1.bf16.msra.mxu0 %v2845_v17  ;;  %v2792_v17 = vcombine.high %v1948_v13, %v1952_v14 }
 0x387   : > { %v3020_v19 = vpop.f32.mrb[32].mxu1 }
 0x388   : > { %v3021_v21 = vpop.f32.mrb[33].mxu1 }
 0x389   : > { %v3022_v24 = vadd.f32 %v3021_v21, %v3020_v19  ;;  %v3023_v25 = vpop.f32.mrb[34].mxu1  ;;  %v1956_v21 = vld [vmem:[#allocation10 + $0x48] sm:$0xff] }
 0x38a   : > { %v3024_v4 = vpop.f32.mrb[35].mxu1 }
 0x38b   : > { %v3025_v27 = vadd.f32 %v3024_v4, %v3023_v25  ;;  %v1768_v28 = vadd.f32 %v3022_v24, %v2763_v22  ;;  %v1960_v24 = vld [vmem:[#allocation10 + $0x68] sm:$0xff]  ;;  %v1871_v25 = vld [vmem:[%s4081_s7] sm:$0xf]  ;;  %v2791_v4 = vcombine.low %v1948_v13, %v1952_v14  ;;  %v1974_v13 = vld [vmem:[#allocation10 + $0xd8] sm:$0xff] }
 0x38c   : > { %v3131_v29 = vpop.f32.mrb[32].mxu0  ;;  %v1978_v14 = vld [vmem:[#allocation10 + $0xf8] sm:$0xff] }
 0x38d   : > { %v1832_v30 = vpop.f32.mrb[33].mxu0  ;;  %v1771_v18 = vadd.f32 %v3025_v27, %v2763_v22  ;;  %v1964_v27 = vld [vmem:[#allocation10 + $0x88] sm:$0xff] }
 0x38e   : > { %v1833_v31 = vadd.f32 %v1832_v30, %v1768_v28  ;;  %v3132_v32 = vpop.f32.mrb[34].mxu0  ;;  %v2799_v28 = vcombine.low %v1956_v21, %v1960_v24  ;;  %v1972_v30 = vld [vmem:[#allocation10 + $0xc8] sm:$0xff] }
 0x38f   : > { %v3026_v20 = vpop.f32.mrb[36].mxu1  ;;  %v1835_v33 = vpop.f32.mrb[35].mxu0 }
 0x390   : > { %v1836_v34 = vadd.f32 %v1835_v33, %v1771_v18  ;;  %v3027_v37 = vpop.f32.mrb[37].mxu1  ;;  %v1863_v40 = vmax.f32 %v1833_v31, 0.0  ;;  %v1976_v18 = vld [vmem:[#allocation10 + $0xe8] sm:$0xff] }
 0x391   : > { %v3028_v38 = vadd.f32 %v3027_v37, %v3026_v20  ;;  %v3029_v39 = vpop.f32.mrb[38].mxu1  ;;  %v1980_v20 = vld [vmem:[#allocation10 + $0x108] sm:$0xff] }
 0x392   : > { %v1864_v41 = vmax.f32 %v1836_v34, 0.0  ;;  %v3030_v42 = vpop.f32.mrb[39].mxu1  ;;  %v1984_v33 = vld [vmem:[#allocation10 + $0x128] sm:$0xff]  ;;  %v2815_v34 = vcombine.low %v1972_v30, %v1976_v18 }
 0x393   : > { %v1776_v43 = vadd.f32 %v3028_v38, %v2763_v22  ;;  %v3031_v26 = vadd.f32 %v3030_v42, %v3029_v39  ;;  %v2824_v37 = vcombine.high %v1980_v20, %v1984_v33  ;;  %v1988_v38 = vld [vmem:[#allocation10 + $0x148] sm:$0xff] }
 0x394   : > { %v3157_v44 = vpack.c.bf16 %v1864_v41, %v1863_v40  ;;  %v1992_v39 = vld [vmem:[#allocation10 + $0x168] sm:$0xff]  ;;  %v2823_v40 = vcombine.low %v1980_v20, %v1984_v33 }
 0x395   : > { %v1841_v45 = vadd.f32 %v3131_v29, %v1776_v43  ;;  %v1779_v46 = vadd.f32 %v3031_v26, %v2763_v22  ;;  %v3135_v47 = vpop.f32.mrb[36].mxu0  ;;  %v2832_v41 = vcombine.high %v1988_v38, %v1992_v39  ;;  %v1996_v42 = vld [vmem:[#allocation10 + $0x188] sm:$0xff]  ;;  %v2831_v26 = vcombine.low %v1988_v38, %v1992_v39  ;;  %v2001_v38 = vld [vmem:[#allocation10 + $0x1b0] sm:$0xff]  ;;  %v1998_v39 = vld [vmem:[#allocation10 + $0x198] sm:$0xff] }
 0x396   : > { %v1848_v48 = vpop.f32.mrb[37].mxu0  ;;  %3158 = vmatpush3.bf16.msra.mxu1 %v3157_v44  ;;  %v2000_v43 = vld [vmem:[#allocation10 + $0x1a8] sm:$0xff] }
 0x397   : > { %v1844_v36 = vadd.f32 %v3132_v32, %v1779_v46  ;;  %v3032_v50 = vpop.f32.mrb[40].mxu1  ;;  %v3136_v35 = vpop.f32.mrb[38].mxu0  ;;  %3159 = vmatprep.subr.bf16.mxu1 %v3582_v49  ;;  %v1865_v53 = vmax.f32 %v1841_v45, 0.0  ;;  %v2816_v32 = vcombine.high %v1972_v30, %v1976_v18  ;;  %v2840_v44 = vcombine.high %v1996_v42, %v2000_v43  ;;  %v2004_v45 = vld [vmem:[#allocation10 + $0x1c8] sm:$0xff]  ;;  %v1993_v30 = vld [vmem:[#allocation10 + $0x170] sm:$0xff]  ;;  %v1990_v18 = vld [vmem:[#allocation10 + $0x158] sm:$0xff] }
 0x398   : > { %v3033_v51 = vpop.f32.mrb[41].mxu1  ;;  %v1851_v52 = vpop.f32.mrb[39].mxu0  ;;  %v2008_v46 = vld [vmem:[#allocation10 + $0x1e8] sm:$0xff] }
 0x399   : > { %v1866_v54 = vmax.f32 %v1844_v36, 0.0  ;;  %v3034_v55 = vadd.f32 %v3033_v51, %v3032_v50  ;;  %v3035_v56 = vpop.f32.mrb[42].mxu1  ;;  %v2847_v36 = vcombine.low %v2004_v45, %v2008_v46  ;;  %v1949_v50 = vld [vmem:[#allocation10 + $0x10] sm:$0xff]  ;;  %v1950_v51 = vld [vmem:[#allocation10 + $0x18] sm:$0xff] }
 0x39a   : > { %v3036_v57 = vpop.f32.mrb[43].mxu1 }
 0x39b   : > { %v3160_v23 = vpack.c.bf16 %v1866_v54, %v1865_v53  ;;  %v1784_v58 = vadd.f32 %v3034_v55, %v2763_v22  ;;  %v3037_v59 = vadd.f32 %v3036_v57, %v3035_v56  ;;  %v1954_v54 = vld [vmem:[#allocation10 + $0x38] sm:$0xff]  ;;  %v3585_v55 = vmov 0  }
 0x39c   : > { %2405 = vmatprep.mubr.bf16.mxu0 %v3585_v55  ;;  %v2795_v56 = vcombine.low %v1950_v51, %v1954_v54  ;;  %v2796_v57 = vcombine.high %v1950_v51, %v1954_v54 }
 0x39d   : > { %v1849_v60 = vadd.f32 %v1848_v48, %v1784_v58  ;;  %v1787_v61 = vadd.f32 %v3037_v59, %v2763_v22  ;;  %3161 = vmatpush3.bf16.msra.mxu1 %v3160_v23  ;;  %v2848_v48 = vcombine.high %v2004_v45, %v2008_v46  ;;  %v1957_v23 = vld [vmem:[#allocation10 + $0x50] sm:$0xff]  ;;  %v1958_v59 = vld [vmem:[#allocation10 + $0x58] sm:$0xff] }
 0x39e   : > { %3162 = vmatprep.subr.bf16.mxu1 %v3582_v49  ;;  %v1961_v58 = vld [vmem:[#allocation10 + $0x70] sm:$0xff]  ;;  %v2006_v46 = vld [vmem:[#allocation10 + $0x1d8] sm:$0xff] }
 0x39f   : > { %v1852_v62 = vadd.f32 %v1851_v52, %v1787_v61  ;;  %v3038_v63 = vpop.f32.mrb[44].mxu1  ;;  %v1867_v1 = vmax.f32 %v1849_v60, 0.0  ;;  %v1962_v60 = vld [vmem:[#allocation10 + $0x78] sm:$0xff]  ;;  %v2009_v45 = vld [vmem:[#allocation10 + $0x1f0] sm:$0xff] }
 0x3a0   : > { %v3039_v0 = vpop.f32.mrb[45].mxu1 }
 0x3a1   : > { %v1868_v2 = vmax.f32 %v1852_v62, 0.0  ;;  %v3040_v3 = vadd.f32 %v3039_v0, %v3038_v63  ;;  %v3041_v5 = vpop.f32.mrb[46].mxu1  ;;  %v2802_v0 = vcombine.high %v1957_v23, %v1961_v58 }
 0x3a2   : > { %v3042_v6 = vpop.f32.mrb[47].mxu1 }
 0x3a3   : > { %v3163_v7 = vpack.c.bf16 %v1868_v2, %v1867_v1  ;;  %v1792_v8 = vadd.f32 %v3040_v3, %v2763_v22  ;;  %v3043_v9 = vadd.f32 %v3042_v6, %v3041_v5  ;;  %v2804_v1 = vcombine.high %v1958_v59, %v1962_v60  ;;  %v1965_v2 = vld [vmem:[#allocation10 + $0x90] sm:$0xff]  ;;  %v1966_v5 = vld [vmem:[#allocation10 + $0x98] sm:$0xff] }
 0x3a4   : > { %v1969_v3 = vld [vmem:[#allocation10 + $0xb0] sm:$0xff]  ;;  %v1970_v6 = vld [vmem:[#allocation10 + $0xb8] sm:$0xff] }
 0x3a5   : > { %v1857_v10 = vadd.f32 %v3135_v47, %v1792_v8  ;;  %v1795_v11 = vadd.f32 %v3043_v9, %v2763_v22  ;;  %3164 = vmatpush3.bf16.msra.mxu1 %v3163_v7  ;;  %v2800_v22 = vcombine.high %v1956_v21, %v1960_v24  ;;  %v2839_v47 = vcombine.low %v1996_v42, %v2000_v43  ;;  %v1981_v21 = vld [vmem:[#allocation10 + $0x110] sm:$0xff] }
 0x3a6   : > { %3165 = vmatprep.subr.bf16.mxu1 %v3582_v49  ;;  %v1968_v49 = vld [vmem:[#allocation10 + $0xa8] sm:$0xff]  ;;  %v2801_v7 = vcombine.low %v1957_v23, %v1961_v58  ;;  %v2803_v8 = vcombine.low %v1958_v59, %v1962_v60  ;;  %v2810_v9 = vcombine.high %v1965_v2, %v1969_v3  ;;  %v1985_v24 = vld [vmem:[#allocation10 + $0x130] sm:$0xff] }
 0x3a7   : > { %v1860_v12 = vadd.f32 %v3136_v35, %v1795_v11  ;;  %v1869_v15 = vmax.f32 %v1857_v10, 0.0  ;;  %v2808_v29 = vcombine.high %v1964_v27, %v1968_v49  ;;  %v2807_v31 = vcombine.low %v1964_v27, %v1968_v49  ;;  %v1953_v35 = vld [vmem:[#allocation10 + $0x30] sm:$0xff] }
 0x3a8   : > { %v2793_v52 = vcombine.low %v1949_v50, %v1953_v35  ;;  %v2794_v53 = vcombine.high %v1949_v50, %v1953_v35  ;;  %v2812_v10 = vcombine.high %v1966_v5, %v1970_v6  ;;  %v1973_v11 = vld [vmem:[#allocation10 + $0xd0] sm:$0xff]  ;;  %v2819_v27 = vcombine.low %v1974_v13, %v1978_v14 }
 0x3a9   : > { %v1870_v16 = vmax.f32 %v1860_v12, 0.0  ;;  %v1977_v12 = vld [vmem:[#allocation10 + $0xf0] sm:$0xff]  ;;  %v2826_v49 = vcombine.high %v1981_v21, %v1985_v24 }
 0x3aa   : > { %2455 = vmatprep.subr.bf16.mxu0 %v2794_v53  ;;  %v2013_v53 = vlaneseq }
 0x3ab   : > { %v3166_v19 = vpack.c.bf16 %v1870_v16, %v1869_v15  ;;  %v2809_v15 = vcombine.low %v1965_v2, %v1969_v3  ;;  %v2811_v16 = vcombine.low %v1966_v5, %v1970_v6 }
 0x3ac   : > { %v2014_v54 = vshrl.u32 %v2013_v53, 7 }
 0x3ad   : > { %3167 = vmatpush3.bf16.msra.mxu1 %v3166_v19  ;;  %v2820_v19 = vcombine.high %v1974_v13, %v1978_v14 }
 0x3ae   : > { %2414 = vmatprep.subr.bf16.mxu1 %v2792_v17  ;;  %v2818_v17 = vcombine.high %v1973_v11, %v1977_v12  ;;  %v2019_v23 = vsub.s32 1, %v2014_v54  ;;  %v2027_v58 = vsub.s32 3, %v2014_v54  ;;  %v2031_v14 = vsub.s32 4, %v2014_v54 }
 0x3b0   : > { %3154 = vmatmul.mubr.msk.f32.vlgmr.msra.gmra.mrb[48].mxu1 %vm1872_vm8, %v1871_v25  ;;  %v1982_v25 = vld [vmem:[#allocation10 + $0x118] sm:$0xff] }
 0x3b1   : > { %2415 = vmatpush1.bf16.msra.mxu1 %v2791_v4  ;;  %2446 = vmatprep.mubr.bf16.mxu1 %v3585_v55  ;;  %v1986_v4 = vld [vmem:[#allocation10 + $0x138] sm:$0xff] }
 0x3b2   : > { %2416 = vmatprep.subr.bf16.mxu1 %v2800_v22  ;;  %v2817_v22 = vcombine.low %v1973_v11, %v1977_v12  ;;  %v2827_v20 = vcombine.low %v1982_v25, %v1986_v4 }
 0x3b5   : > { %2417 = vmatpush1.bf16.msra.mxu1 %v2799_v28  ;;  %v2828_v28 = vcombine.high %v1982_v25, %v1986_v4 }
 0x3b6   : > { %2418 = vmatprep.subr.bf16.mxu1 %v2808_v29  ;;  %v1989_v29 = vld [vmem:[#allocation10 + $0x150] sm:$0xff] }
 0x3b7   : > { %v2834_v33 = vcombine.high %v1989_v29, %v1993_v30 }
 0x3b9   : > { %2419 = vmatpush1.bf16.msra.mxu1 %v2807_v31  ;;  %v1994_v31 = vld [vmem:[#allocation10 + $0x178] sm:$0xff] }
 0x3ba   : > { %2420 = vmatprep.subr.bf16.mxu1 %v2816_v32  ;;  %v2825_v32 = vcombine.low %v1981_v21, %v1985_v24  ;;  %v2835_v42 = vcombine.low %v1990_v18, %v1994_v31 }
 0x3bd   : > { %2421 = vmatpush1.bf16.msra.mxu1 %v2815_v34  ;;  %v2836_v34 = vcombine.high %v1990_v18, %v1994_v31 }
 0x3be   : > { %2422 = vmatprep.subr.bf16.mxu1 %v2824_v37  ;;  %v1997_v37 = vld [vmem:[#allocation10 + $0x190] sm:$0xff] }
 0x3bf   : > { %v2842_v43 = vcombine.high %v1997_v37, %v2001_v38 }
 0x3c1   : > { %2423 = vmatpush1.bf16.msra.mxu1 %v2823_v40  ;;  %v2002_v40 = vld [vmem:[#allocation10 + $0x1b8] sm:$0xff] }
 0x3c2   : > { %2424 = vmatprep.subr.bf16.mxu1 %v2832_v41  ;;  %v2833_v41 = vcombine.low %v1989_v29, %v1993_v30 }
 0x3c5   : > { %2425 = vmatpush1.bf16.msra.mxu1 %v2831_v26  ;;  %v2844_v26 = vcombine.high %v1998_v39, %v2002_v40 }
 0x3c6   : > { %2426 = vmatprep.subr.bf16.mxu1 %v2840_v44  ;;  %v2005_v44 = vld [vmem:[#allocation10 + $0x1d0] sm:$0xff] }
 0x3c7   : > { %v2850_v50 = vcombine.high %v2005_v44, %v2009_v45  ;;  %v2849_v51 = vcombine.low %v2005_v44, %v2009_v45 }
 0x3c9   : > { %2427 = vmatpush1.bf16.msra.mxu1 %v2839_v47  ;;  %v2010_v47 = vld [vmem:[#allocation10 + $0x1f8] sm:$0xff] }
 0x3ca   : > { %2428 = vmatprep.subr.bf16.mxu1 %v2848_v48  ;;  %v2841_v48 = vcombine.low %v1997_v37, %v2001_v38  ;;  %v2852_v35 = vcombine.high %v2006_v46, %v2010_v47 }
 0x3cd   : > { %2429 = vmatpush1.bf16.msra.mxu1 %v2847_v36  ;;  %v2843_v36 = vcombine.low %v1998_v39, %v2002_v40 }
 0x3ce   : > { %2496 = vmatprep.subr.bf16.mxu1 %v2796_v57  ;;  %v2011_v57 = vld [vmem:[%s4113_s20] sm:$0xff] }
 0x483   : > { %v1942_v61 = vpop.f32.mrb[48].mxu1 }
 0x484   : > { %v4016_v62 = vpack.c.bf16 %v1942_v61, %v1942_v61  ;;  %v3155_v63 = vpop.f32.mrb[49].mxu1  ;;  %v2020_v61 = vrot.slane %v2011_v57, %v2019_v23 }
 0x485   : > { %v2028_v63 = vrot.slane %v2011_v57, %v2027_v58 }
 0x486   : > { %2406 = vmatmul.mubr.bf16.vlgmr.msra.gmra.mrb[40].mxu0 %v4016_v62  ;;  %2447 = vmatmul.mubr.bf16.vlgmr.msra.gmra.mrb[52].mxu1 %v4016_v62 }
 0x487   : > { %2456 = vmatpush1.bf16.msra.mxu0 %v2793_v52  ;;  %2497 = vmatpush1.bf16.msra.mxu1 %v2795_v56  ;;  %v2851_v52 = vcombine.low %v2006_v46, %v2010_v47  ;;  %v2023_v56 = vsub.s32 2, %v2014_v54 }
 0x488   : > { %2457 = vmatprep.subr.bf16.mxu0 %v2802_v0  ;;  %2498 = vmatprep.subr.bf16.mxu1 %v2804_v1 }
 0x489   : > { %2487 = vmatprep.mubr.bf16.mxu0 %v3585_v55  ;;  %2528 = vmatprep.mubr.bf16.mxu1 %v3585_v55  ;;  %v2015_v55 = vsub.s32 0, %v2014_v54  ;;  %v2024_v60 = vrot.slane %v2011_v57, %v2023_v56 }
 0x48b   : > { %2458 = vmatpush1.bf16.msra.mxu0 %v2801_v7  ;;  %2499 = vmatpush1.bf16.msra.mxu1 %v2803_v8  ;;  %v2016_v59 = vrot.slane %v2011_v57, %v2015_v55 }
 0x48c   : > { %2459 = vmatprep.subr.bf16.mxu0 %v2810_v9  ;;  %2500 = vmatprep.subr.bf16.mxu1 %v2812_v10 }
 0x48f   : > { %2460 = vmatpush1.bf16.msra.mxu0 %v2809_v15  ;;  %2501 = vmatpush1.bf16.msra.mxu1 %v2811_v16  ;;  %v2039_v15 = vsub.s32 6, %v2014_v54  ;;  %v2035_v16 = vsub.s32 5, %v2014_v54 }
 0x490   : > { %2461 = vmatprep.subr.bf16.mxu0 %v2818_v17  ;;  %2502 = vmatprep.subr.bf16.mxu1 %v2820_v19  ;;  %v2043_v17 = vsub.s32 7, %v2014_v54  ;;  %v2032_v19 = vrot.slane %v2011_v57, %v2031_v14 }
 0x491   : > { %v2040_v21 = vrot.slane %v2011_v57, %v2039_v15  ;;  %v2036_v24 = vrot.slane %v2011_v57, %v2035_v16 }
 0x492   : > { %v2044_v25 = vrot.slane %v2011_v57, %v2043_v17 }
 0x493   : > { %2462 = vmatpush1.bf16.msra.mxu0 %v2817_v22  ;;  %2503 = vmatpush1.bf16.msra.mxu1 %v2819_v27 }
 0x494   : > { %2463 = vmatprep.subr.bf16.mxu0 %v2826_v49  ;;  %2504 = vmatprep.subr.bf16.mxu1 %v2828_v28 }
 0x497   : > { %2464 = vmatpush1.bf16.msra.mxu0 %v2825_v32  ;;  %2505 = vmatpush1.bf16.msra.mxu1 %v2827_v20 }
 0x498   : > { %2465 = vmatprep.subr.bf16.mxu0 %v2834_v33  ;;  %2506 = vmatprep.subr.bf16.mxu1 %v2836_v34 }
 0x49b   : > { %2466 = vmatpush1.bf16.msra.mxu0 %v2833_v41  ;;  %2507 = vmatpush1.bf16.msra.mxu1 %v2835_v42 }
 0x49c   : > { %2467 = vmatprep.subr.bf16.mxu0 %v2842_v43  ;;  %2508 = vmatprep.subr.bf16.mxu1 %v2844_v26 }
 0x49f   : > { %2468 = vmatpush1.bf16.msra.mxu0 %v2841_v48  ;;  %2509 = vmatpush1.bf16.msra.mxu1 %v2843_v36 }
 0x4a0   : > { %2469 = vmatprep.subr.bf16.mxu0 %v2850_v50  ;;  %2510 = vmatprep.subr.bf16.mxu1 %v2852_v35 }
 0x4a3   : > { %2470 = vmatpush1.bf16.msra.mxu0 %v2849_v51  ;;  %2511 = vmatpush1.bf16.msra.mxu1 %v2851_v52 }
 0x4a6   : > { %2488 = vmatmul.mubr.bf16.vlgmr.msra.gmra.mrb[44].mxu0 %v4016_v62  ;;  %2529 = vmatmul.mubr.bf16.vlgmr.msra.gmra.mrb[56].mxu1 %v4016_v62 }
 0x559   : > { %v2407_v0 = vpop.f32.mrb[40].mxu0  ;;  %v2448_v1 = vpop.f32.mrb[52].mxu1 }
 0x55a   : > { %v2408_v2 = vadd.f32 %v2407_v0, %v2016_v59  ;;  %v2449_v3 = vadd.f32 %v2448_v1, %v2024_v60  ;;  %v2409_v62 = vpop.f32.mrb[41].mxu0  ;;  %v2450_v5 = vpop.f32.mrb[53].mxu1 }
 0x55b   : > { %v2410_v6 = vadd.f32 %v2409_v62, %v2020_v61  ;;  %v2451_v7 = vadd.f32 %v2450_v5, %v2028_v63  ;;  %v2411_v8 = vpop.f32.mrb[42].mxu0  ;;  %v2452_v9 = vpop.f32.mrb[54].mxu1 }
 0x55c   : > { %v2412_v10 = vpop.f32.mrb[43].mxu0  ;;  %v2453_v11 = vpop.f32.mrb[55].mxu1 }
 0x55d   : > { %v2545_v12 = vcombine.low %v2408_v2, %v2410_v6  ;;  %v2546_v13 = vcombine.low %v2449_v3, %v2451_v7 }
 0x55f   : > { %2553 = vst [vmem:[%s435_s27] sm:$0xff] %v2545_v12  ;;  %2554 = vst [vmem:[%s435_s27 + $0x8] sm:$0xff] %v2546_v13 }
 0x579   : > { %v2489_v4 = vpop.f32.mrb[44].mxu0  ;;  %v2530_v22 = vpop.f32.mrb[56].mxu1 }
 0x57a   : > { %v2490_v27 = vadd.f32 %v2489_v4, %v2032_v19  ;;  %v2531_v49 = vadd.f32 %v2530_v22, %v2040_v21  ;;  %v2491_v28 = vpop.f32.mrb[45].mxu0  ;;  %v2532_v29 = vpop.f32.mrb[57].mxu1 }
 0x57b   : > { %v2492_v30 = vadd.f32 %v2491_v28, %v2036_v24  ;;  %v2533_v18 = vadd.f32 %v2532_v29, %v2044_v25  ;;  %v2493_v31 = vpop.f32.mrb[46].mxu0  ;;  %v2534_v32 = vpop.f32.mrb[58].mxu1 }
 0x57c   : > { %v2494_v20 = vpop.f32.mrb[47].mxu0  ;;  %v2535_v33 = vpop.f32.mrb[59].mxu1 }
 0x57d   : > { %v2547_v34 = vcombine.low %v2490_v27, %v2492_v30  ;;  %v2548_v37 = vcombine.low %v2531_v49, %v2533_v18 }
 0x57f   : > { %2555 = vst [vmem:[%s435_s27 + $0x10] sm:$0xff] %v2547_v34  ;;  %2556 = vst [vmem:[%s435_s27 + $0x18] sm:$0xff] %v2548_v37 }
 0x580   : > { %3508 = shalt.err (!%p3505_p13)
}
 0x581   : > { %s3509_s25 = scalar_lea.hbm %s4030_s22, 512  ;;  %s3513_s13 = scalar_lea.hbm %s4114_s30, 1024 }
 0x582   : > { %p3510_p9 = scmp.ne.s32.totalorder %s4030_s22, %s3509_s25  ;;  %p3514_p4 = scmp.lt.u32.totalorder %s4030_s22, %s4114_s30 }
 0x583   : > { %p3515_p8 = scmp.lt.u32.totalorder %s3513_s13, %s3509_s25  ;;  %p3517_p10 = scmp.lt.u32.totalorder %s3509_s25, %s4030_s22 }
 0x584   : > { %p3511_p0 = pnand %p3510_p9, %p3813_p3 }
 0x585   : > { %p3516_p6 = por %p3515_p8, %p3514_p4 }
 0x586   : > { %p3512_p11 = pneg %p3511_p0 }
 0x587   : > { %p3518_p5 = por %p3517_p10, %p3516_p6 }
 0x589   : > { %p3519_p7 = pnand %p3518_p5, %p3512_p11 }
 0x58b   : > { %3522 = shalt.err (!%p3519_p7)
}
 0x58c   : > { %3186 = dma.vmem_to_hbm [thread:$0]  (%p3813_p3), %s4032_s19, 512, %s4030_s22, %s2558_s17  }
 0x58d PF: > { %s4115_s21 = sld [smem:[#allocation16_spill]]  ;;  %s4116_s23 = sld [smem:[#allocation17_spill]] }
 0x58e   : > { %p4118_p1 = scmp.ge.s32.totalorder %s3569_s16, 2 }
 0x593   : > { %s2584_s11 = sand.u32 1, %s4115_s21   ;;  %p4117_p12 = scmp.ne.s32.totalorder %s4116_s23, 0 }
 0x594   : > { %s2585_s29 = scalar_lea.sflag [#allocation4], %s2584_s11 }
 0x595   : > { %p3206_p2 = pnand %p4118_p1, %p4117_p12 }
 0x597   : > { %3552 = dma.done.wait (!%p3206_p2), %s2585_s29, 512  }
 0x598   : > { %3554 = vsyncadd (!%p3206_p2), %s2585_s29, 4294966784  ;;  %p25_p13 = scmp.ge.s32.totalorder %s3800_s9, 4   ;;  %s4119_s13 = smov %s3561_s14 }
 0x599   : > { %s4120_s14 = smov %s3565_s15  ;;  %s4121_s15 = smov %s3809_s12 }
 0x59a   : > { %s4122_s16 = smov %s3800_s9  ;;  %27 = sbr.rel (!%p25_p13) target bundleno = 10 (0xa), region = 121 }
 0x5a1   :  { %2590 = vsyncpa [#allocation3], 1 }
 0x5a2   :  { %2592 = vsyncpa [#allocation3 + $0x1], 1 }
 0x5a3   :  { %2593 = vsyncpa [#allocation6], 1 }
 0x5a4   :  { %2594 = vsyncpa [#allocation9], 1 }
 0x5a5   :  { %2595 = vsyncpa [#allocation4], 1 }
 0x5a6   :  { %2597 = vsyncpa [#allocation4 + $0x1], 1 }

</bundles_post_ra>
